<compile_context>
chip_gen: v5e
topology: v5e:2x2
jax: 0.10.0
libtpu: 0.0.40
codegen_flags: <defaults>
</compile_context>

<pallas_src>
from functools import partial

import jax
import jax.numpy as jnp
from jax.experimental import pallas as pl
from jax.experimental.pallas import tpu as pltpu

# ----- model config mirroring FlexibleGNN.__init__ ---------------------------
NODE_IN_DIM = 8      # node_in_dim
EDGE_IN_DIM = 4      # edge_in_dim (unused: 'gcn' => use_edge_attr=False)
HIDDEN_DIM  = 32     # hidden_dim  (kept unpadded; block dims == full array dims)
NUM_CLASSES = 4      # num_classes
NUM_LAYERS  = 2      # num_layers
C_PAD       = 128    # only the HBM-stored output lane dim is padded to 128

# ----- batch geometry: sized so every grid step feeds the MXU real work ------
NUM_GRAPHS       = 32
NODES_PER_GRAPH  = 16
NUM_NODES        = NUM_GRAPHS * NODES_PER_GRAPH          # 512
EDGES_PER_GRAPH  = 32
NUM_EDGES        = NUM_GRAPHS * EDGES_PER_GRAPH          # 1024

GRAPHS_PER_CHUNK = 16                                    # >=8 -> sublane-dense
NUM_CHUNKS       = NUM_GRAPHS // GRAPHS_PER_CHUNK        # 2 grid steps
CHUNK_NODES      = NUM_NODES // NUM_CHUNKS               # 256 rows per step


# ----- Pallas kernel: full forward for one graph chunk ------------------------
def gnn_kernel(x_ref, a_ref, pool_ref,
               w_emb_ref, b_emb_ref,
               w_lay_ref, b_lay_ref,
               w_post_ref, b_post_ref,
               out_ref, *, num_layers):
    x = x_ref[0]        # (CHUNK_NODES, NODE_IN_DIM)       bf16
    a = a_ref[0]        # (CHUNK_NODES, CHUNK_NODES)       f32 (GCN-normalized)
    p = pool_ref[0]     # (GRAPHS_PER_CHUNK, CHUNK_NODES)  f32 (mean-pool rows)

    # node embedding: Linear(node_in_dim, hidden) -> f32 accumulator
    h = jnp.dot(x, w_emb_ref[...],
                preferred_element_type=jnp.float32) + b_emb_ref[...]

    # GCNConv layers + ReLU:  h <- relu( A_norm @ (h @ W_l) + b_l )
    # A_norm is f32 (parity), so the only per-layer cast is h -> bf16 for the
    # weight matmul; the aggregation, bias add and ReLU stay in f32.
    for l in range(num_layers):            # static unroll (num_layers small)
        hw = jnp.dot(h.astype(jnp.bfloat16), w_lay_ref[l],
                     preferred_element_type=jnp.float32)        # (CN, H) f32
        h = jnp.dot(a, hw, preferred_element_type=jnp.float32) + b_lay_ref[l]
        h = jnp.maximum(h, 0.0)

    # global_mean_pool (dense per-chunk pooling rows) + post_gnn Linear
    pooled = jnp.dot(p, h, preferred_element_type=jnp.float32)  # (GPC, H) f32
    out_ref[0] = (jnp.dot(pooled.astype(jnp.bfloat16), w_post_ref[...],
                          preferred_element_type=jnp.float32)
                  + b_post_ref[...])                            # (GPC, C_PAD)


# ----- one-time topology preprocessing (outside the jitted hot path) ---------
def build_gcn_norm_adj_chunks(edge_index, num_chunks, chunk_nodes):
    """Per-chunk A_norm[i,j] = d_i^-1/2 d_j^-1/2 for edge j->i (+ self loops).

    Nodes are chunk-contiguous and edges never cross chunks, so only the
    diagonal blocks of the global A_norm are materialized. f32 for parity.
    """
    src, dst = edge_index[0], edge_index[1]
    chunk_id = dst // chunk_nodes
    ls = src % chunk_nodes
    ld = dst % chunk_nodes
    a = jnp.zeros((num_chunks, chunk_nodes, chunk_nodes), jnp.float32)
    a = a.at[chunk_id, ld, ls].add(1.0)                    # duplicates accumulate
    a = a + jnp.eye(chunk_nodes, dtype=jnp.float32)[None]  # self loops
    deg = a.sum(axis=2)
    dinv = jnp.where(deg > 0, 1.0 / jnp.sqrt(deg), 0.0)
    return dinv[:, :, None] * a * dinv[:, None, :]


def build_mean_pool_chunks(batch, num_chunks, chunk_nodes, graphs_per_chunk):
    """[num_chunks, graphs_per_chunk, chunk_nodes] row-normalized pooling (f32)."""
    b = batch.reshape(num_chunks, chunk_nodes)             # global graph ids
    local = b - (jnp.arange(num_chunks, dtype=batch.dtype)
                 * graphs_per_chunk)[:, None]
    onehot = (local[:, None, :] ==
              jnp.arange(graphs_per_chunk, dtype=batch.dtype)[None, :, None]
              ).astype(jnp.float32)
    counts = jnp.maximum(onehot.sum(axis=2, keepdims=True), 1.0)
    return onehot / counts


def prepare_graph_topology(edge_index, batch):
    """Run once per graph topology; the forward only reuses the results."""
    src, dst = edge_index[0], edge_index[1]
    if not bool(jnp.all((src // CHUNK_NODES) == (dst // CHUNK_NODES))):
        raise ValueError("edge crosses a chunk boundary; block-diagonal A_norm "
                         "assumption violated")
    a_chunks = build_gcn_norm_adj_chunks(edge_index, NUM_CHUNKS, CHUNK_NODES)
    pool_chunks = build_mean_pool_chunks(batch, NUM_CHUNKS, CHUNK_NODES,
                                         GRAPHS_PER_CHUNK)
    return a_chunks, pool_chunks


# ----- parameter init (deterministic, synthetic, torch-like shapes) ----------
def init_params(key):
    ks = jax.random.split(key, 6)
    s = 0.1
    return dict(
        w_emb=s * jax.random.normal(ks[0], (NODE_IN_DIM, HIDDEN_DIM), jnp.float32),
        b_emb=s * jax.random.normal(ks[1], (1, HIDDEN_DIM), jnp.float32),
        w_lay=s * jax.random.normal(ks[2], (NUM_LAYERS, HIDDEN_DIM, HIDDEN_DIM), jnp.float32),
        b_lay=s * jax.random.normal(ks[3], (NUM_LAYERS, 1, HIDDEN_DIM), jnp.float32),
        w_post=s * jax.random.normal(ks[4], (HIDDEN_DIM, NUM_CLASSES), jnp.float32),
        b_post=s * jax.random.normal(ks[5], (1, NUM_CLASSES), jnp.float32),
    )


def prepare_params(p):
    """One-time: bf16 weights, f32 biases; pad only the output lane dim to 128."""
    w_post = (jnp.zeros((HIDDEN_DIM, C_PAD), jnp.float32)
              .at[:, :NUM_CLASSES].set(p["w_post"]))
    b_post = (jnp.zeros((1, C_PAD), jnp.float32)
              .at[:, :NUM_CLASSES].set(p["b_post"]))
    return dict(
        w_emb=p["w_emb"].astype(jnp.bfloat16),
        b_emb=p["b_emb"],
        w_lay=p["w_lay"].astype(jnp.bfloat16),
        b_lay=p["b_lay"],
        w_post=w_post.astype(jnp.bfloat16),
        b_post=b_post,
    )


# ----- wrapper ----------------------------------------------------------------
@jax.jit
def flexible_gnn_forward(x, a_chunks, pool_chunks, params):
    x_chunks = x.reshape(NUM_CHUNKS, CHUNK_NODES, NODE_IN_DIM).astype(jnp.bfloat16)

    const2 = lambda c: (0, 0)        # weights/biases resident across grid steps
    const3 = lambda c: (0, 0, 0)

    grid_spec = pltpu.PrefetchScalarGridSpec(
        num_scalar_prefetch=0,
        grid=(NUM_CHUNKS,),
        in_specs=[
            # per-chunk data, pipelined along the grid
            pl.BlockSpec((1, CHUNK_NODES, NODE_IN_DIM), lambda c: (c, 0, 0)),
            pl.BlockSpec((1, CHUNK_NODES, CHUNK_NODES), lambda c: (c, 0, 0)),
            pl.BlockSpec((1, GRAPHS_PER_CHUNK, CHUNK_NODES), lambda c: (c, 0, 0)),
            # weights / biases: constant block index -> DMA'd once, VMEM-resident
            pl.BlockSpec((NODE_IN_DIM, HIDDEN_DIM), const2),
            pl.BlockSpec((1, HIDDEN_DIM), const2),
            pl.BlockSpec((NUM_LAYERS, HIDDEN_DIM, HIDDEN_DIM), const3),
            pl.BlockSpec((NUM_LAYERS, 1, HIDDEN_DIM), const3),
            pl.BlockSpec((HIDDEN_DIM, C_PAD), const2),
            pl.BlockSpec((1, C_PAD), const2),
        ],
        out_specs=pl.BlockSpec((1, GRAPHS_PER_CHUNK, C_PAD), lambda c: (c, 0, 0)),
    )

    out_padded = pl.pallas_call(
        partial(gnn_kernel, num_layers=NUM_LAYERS),
        out_shape=jax.ShapeDtypeStruct(
            (NUM_CHUNKS, GRAPHS_PER_CHUNK, C_PAD), jnp.float32),
        grid_spec=grid_spec,
        compiler_params=pltpu.CompilerParams(
            dimension_semantics=("parallel",)),      # shard chunks across TCs
    )(x_chunks, a_chunks, pool_chunks,
      params["w_emb"], params["b_emb"],
      params["w_lay"], params["b_lay"],
      params["w_post"], params["b_post"])

    # drop lane padding: [num_chunks, gpc, C_PAD] -> [num_graphs, num_classes]
    out = out_padded.reshape(NUM_GRAPHS, C_PAD)
    return out[:, :NUM_CLASSES]


if __name__ == "__main__":
    key = jax.random.PRNGKey(0)
    k_x, k_e, k_p = jax.random.split(key, 3)

    # Node features [num_nodes, node_in_dim]
    x = jax.random.normal(k_x, (NUM_NODES, NODE_IN_DIM), jnp.float32)

    # Edges confined within each graph (graphs are node-contiguous)
    edge_chunks = []
    ek = jax.random.split(k_e, NUM_GRAPHS)
    for g in range(NUM_GRAPHS):
        e = jax.random.randint(ek[g], (2, EDGES_PER_GRAPH), 0, NODES_PER_GRAPH)
        edge_chunks.append(e + g * NODES_PER_GRAPH)
    edge_index = jnp.concatenate(edge_chunks, axis=1).astype(jnp.int32)  # [2, E]

    # Batch assignment [num_nodes]
    batch = jnp.repeat(jnp.arange(NUM_GRAPHS, dtype=jnp.int32), NODES_PER_GRAPH)

    # TODO(synk): edge_attr is accepted by the module but unused for 'gcn'
    # (use_edge_attr=False), so no edge-embedding path is implemented.

    # One-time preprocessing (topology + params), reused across forward calls.
    a_chunks, pool_chunks = prepare_graph_topology(edge_index, batch)
    params = prepare_params(init_params(k_p))

    out = flexible_gnn_forward(x, a_chunks, pool_chunks, params)
    jax.block_until_ready(out)
    assert out.shape == (NUM_GRAPHS, NUM_CLASSES)
    print("KERNEL_OK")
</pallas_src>

<mosaic_0001>
module attributes {stable_mosaic.version = 11 : i64} {
  func.func @gnn_kernel(%arg0: i32, %arg1: memref<1x256x8xbf16, #tpu.memory_space<vmem>>, %arg2: memref<1x256x256xf32, #tpu.memory_space<vmem>>, %arg3: memref<1x16x256xf32, #tpu.memory_space<vmem>>, %arg4: memref<8x32xbf16, #tpu.memory_space<vmem>>, %arg5: memref<1x32xf32, #tpu.memory_space<vmem>>, %arg6: memref<2x32x32xbf16, #tpu.memory_space<vmem>>, %arg7: memref<2x1x32xf32, #tpu.memory_space<vmem>>, %arg8: memref<32x128xbf16, #tpu.memory_space<vmem>>, %arg9: memref<1x128xf32, #tpu.memory_space<vmem>>, %arg10: memref<1x16x128xf32, #tpu.memory_space<vmem>>) attributes {dimension_semantics = [#tpu.dimension_semantics<parallel>], iteration_bounds = array<i64: 2>, scalar_prefetch = 0 : i64, scratch_operands = 0 : i64, tpu.core_type = #tpu.core_type<tc>, window_params = [{transform_indices = @transform_0, window_bounds = array<i64: 1, 256, 8>}, {transform_indices = @transform_1, window_bounds = array<i64: 1, 256, 256>}, {transform_indices = @transform_2, window_bounds = array<i64: 1, 16, 256>}, {pipeline_mode = #tpu.pipeline_mode<synchronous>, transform_indices = @transform_3, window_bounds = array<i64: 8, 32>}, {pipeline_mode = #tpu.pipeline_mode<synchronous>, transform_indices = @transform_4, window_bounds = array<i64: 1, 32>}, {pipeline_mode = #tpu.pipeline_mode<synchronous>, transform_indices = @transform_5, window_bounds = array<i64: 2, 32, 32>}, {pipeline_mode = #tpu.pipeline_mode<synchronous>, transform_indices = @transform_6, window_bounds = array<i64: 2, 1, 32>}, {pipeline_mode = #tpu.pipeline_mode<synchronous>, transform_indices = @transform_7, window_bounds = array<i64: 32, 128>}, {pipeline_mode = #tpu.pipeline_mode<synchronous>, transform_indices = @transform_8, window_bounds = array<i64: 1, 128>}, {transform_indices = @transform_9, window_bounds = array<i64: 1, 16, 128>}]} {
    %c0 = arith.constant 0 : index
    %c0_0 = arith.constant 0 : index
    %c0_1 = arith.constant 0 : index
    %0 = vector.load %arg1[%c0, %c0_0, %c0_1] : memref<1x256x8xbf16, #tpu.memory_space<vmem>>, vector<1x256x8xbf16>
    %1 = vector.shape_cast %0 : vector<1x256x8xbf16> to vector<256x8xbf16>
    %c0_2 = arith.constant 0 : index
    %c0_3 = arith.constant 0 : index
    %c0_4 = arith.constant 0 : index
    %2 = vector.load %arg2[%c0_2, %c0_3, %c0_4] : memref<1x256x256xf32, #tpu.memory_space<vmem>>, vector<1x256x256xf32>
    %3 = vector.shape_cast %2 : vector<1x256x256xf32> to vector<256x256xf32>
    %c0_5 = arith.constant 0 : index
    %c0_6 = arith.constant 0 : index
    %c0_7 = arith.constant 0 : index
    %4 = vector.load %arg3[%c0_5, %c0_6, %c0_7] : memref<1x16x256xf32, #tpu.memory_space<vmem>>, vector<1x16x256xf32>
    %5 = vector.shape_cast %4 : vector<1x16x256xf32> to vector<16x256xf32>
    %c0_8 = arith.constant 0 : index
    %c0_9 = arith.constant 0 : index
    %6 = vector.load %arg4[%c0_8, %c0_9] : memref<8x32xbf16, #tpu.memory_space<vmem>>, vector<8x32xbf16>
    %cst = arith.constant dense<0.000000e+00> : vector<256x32xf32>
    %7 = tpu.matmul %1, %6, %cst {dimension_numbers = #tpu.dot_dimension_numbers<[1], [0], [0], [1], [0, 0, 1, 1], [], []>} : vector<256x8xbf16>, vector<8x32xbf16>, vector<256x32xf32> -> vector<256x32xf32>
    %c0_10 = arith.constant 0 : index
    %c0_11 = arith.constant 0 : index
    %8 = vector.load %arg5[%c0_10, %c0_11] : memref<1x32xf32, #tpu.memory_space<vmem>>, vector<1x32xf32>
    %9 = vector.broadcast %8 : vector<1x32xf32> to vector<256x32xf32>
    %10 = arith.addf %7, %9 : vector<256x32xf32>
    %11 = arith.truncf %10 : vector<256x32xf32> to vector<256x32xbf16>
    %c0_12 = arith.constant 0 : index
    %c0_13 = arith.constant 0 : index
    %c0_14 = arith.constant 0 : index
    %12 = vector.load %arg6[%c0_12, %c0_13, %c0_14] : memref<2x32x32xbf16, #tpu.memory_space<vmem>>, vector<1x32x32xbf16>
    %13 = vector.shape_cast %12 : vector<1x32x32xbf16> to vector<32x32xbf16>
    %cst_15 = arith.constant dense<0.000000e+00> : vector<256x32xf32>
    %14 = tpu.matmul %11, %13, %cst_15 {dimension_numbers = #tpu.dot_dimension_numbers<[1], [0], [0], [1], [0, 0, 1, 1], [], []>} : vector<256x32xbf16>, vector<32x32xbf16>, vector<256x32xf32> -> vector<256x32xf32>
    %cst_16 = arith.constant dense<0.000000e+00> : vector<256x32xf32>
    %15 = tpu.matmul %3, %14, %cst_16 {dimension_numbers = #tpu.dot_dimension_numbers<[1], [0], [0], [1], [0, 0, 1, 1], [], []>} : vector<256x256xf32>, vector<256x32xf32>, vector<256x32xf32> -> vector<256x32xf32>
    %c0_17 = arith.constant 0 : index
    %c0_18 = arith.constant 0 : index
    %c0_19 = arith.constant 0 : index
    %16 = vector.load %arg7[%c0_17, %c0_18, %c0_19] : memref<2x1x32xf32, #tpu.memory_space<vmem>>, vector<1x1x32xf32>
    %17 = vector.shape_cast %16 : vector<1x1x32xf32> to vector<1x32xf32>
    %18 = vector.broadcast %17 : vector<1x32xf32> to vector<256x32xf32>
    %19 = arith.addf %15, %18 : vector<256x32xf32>
    %cst_20 = arith.constant 0.000000e+00 : f32
    %20 = vector.broadcast %cst_20 : f32 to vector<256x32xf32>
    %21 = arith.maximumf %19, %20 : vector<256x32xf32>
    %22 = arith.truncf %21 : vector<256x32xf32> to vector<256x32xbf16>
    %c1 = arith.constant 1 : index
    %c0_21 = arith.constant 0 : index
    %c0_22 = arith.constant 0 : index
    %23 = vector.load %arg6[%c1, %c0_21, %c0_22] : memref<2x32x32xbf16, #tpu.memory_space<vmem>>, vector<1x32x32xbf16>
    %24 = vector.shape_cast %23 : vector<1x32x32xbf16> to vector<32x32xbf16>
    %cst_23 = arith.constant dense<0.000000e+00> : vector<256x32xf32>
    %25 = tpu.matmul %22, %24, %cst_23 {dimension_numbers = #tpu.dot_dimension_numbers<[1], [0], [0], [1], [0, 0, 1, 1], [], []>} : vector<256x32xbf16>, vector<32x32xbf16>, vector<256x32xf32> -> vector<256x32xf32>
    %cst_24 = arith.constant dense<0.000000e+00> : vector<256x32xf32>
    %26 = tpu.matmul %3, %25, %cst_24 {dimension_numbers = #tpu.dot_dimension_numbers<[1], [0], [0], [1], [0, 0, 1, 1], [], []>} : vector<256x256xf32>, vector<256x32xf32>, vector<256x32xf32> -> vector<256x32xf32>
    %c1_25 = arith.constant 1 : index
    %c0_26 = arith.constant 0 : index
    %c0_27 = arith.constant 0 : index
    %27 = vector.load %arg7[%c1_25, %c0_26, %c0_27] : memref<2x1x32xf32, #tpu.memory_space<vmem>>, vector<1x1x32xf32>
    %28 = vector.shape_cast %27 : vector<1x1x32xf32> to vector<1x32xf32>
    %29 = vector.broadcast %28 : vector<1x32xf32> to vector<256x32xf32>
    %30 = arith.addf %26, %29 : vector<256x32xf32>
    %cst_28 = arith.constant 0.000000e+00 : f32
    %31 = vector.broadcast %cst_28 : f32 to vector<256x32xf32>
    %32 = arith.maximumf %30, %31 : vector<256x32xf32>
    %cst_29 = arith.constant dense<0.000000e+00> : vector<16x32xf32>
    %33 = tpu.matmul %5, %32, %cst_29 {dimension_numbers = #tpu.dot_dimension_numbers<[1], [0], [0], [1], [0, 0, 1, 1], [], []>} : vector<16x256xf32>, vector<256x32xf32>, vector<16x32xf32> -> vector<16x32xf32>
    %34 = arith.truncf %33 : vector<16x32xf32> to vector<16x32xbf16>
    %c0_30 = arith.constant 0 : index
    %c0_31 = arith.constant 0 : index
    %35 = vector.load %arg8[%c0_30, %c0_31] : memref<32x128xbf16, #tpu.memory_space<vmem>>, vector<32x128xbf16>
    %cst_32 = arith.constant dense<0.000000e+00> : vector<16x128xf32>
    %36 = tpu.matmul %34, %35, %cst_32 {dimension_numbers = #tpu.dot_dimension_numbers<[1], [0], [0], [1], [0, 0, 1, 1], [], []>} : vector<16x32xbf16>, vector<32x128xbf16>, vector<16x128xf32> -> vector<16x128xf32>
    %c0_33 = arith.constant 0 : index
    %c0_34 = arith.constant 0 : index
    %37 = vector.load %arg9[%c0_33, %c0_34] : memref<1x128xf32, #tpu.memory_space<vmem>>, vector<1x128xf32>
    %38 = vector.broadcast %37 : vector<1x128xf32> to vector<16x128xf32>
    %39 = arith.addf %36, %38 : vector<16x128xf32>
    %c0_35 = arith.constant 0 : index
    %c0_36 = arith.constant 0 : index
    %c0_37 = arith.constant 0 : index
    %40 = vector.load %arg10[%c0_35, %c0_36, %c0_37] : memref<1x16x128xf32, #tpu.memory_space<vmem>>, vector<1x16x128xf32>
    %41 = vector.shape_cast %40 : vector<1x16x128xf32> to vector<16x128xf32>
    %42 = vector.shape_cast %39 : vector<16x128xf32> to vector<1x16x128xf32>
    tpu.vector_store %arg10[%c0_35, %c0_36, %c0_37], %42 {strides = array<i32>} : memref<1x16x128xf32, #tpu.memory_space<vmem>>, vector<1x16x128xf32>,
    return
  }
  func.func @transform_0(%arg0: i32) -> (i32, i32, i32) {
    %c0_i32 = arith.constant 0 : i32
    %c0_i32_0 = arith.constant 0 : i32
    %c0_i32_1 = arith.constant 0 : i32
    return %arg0, %c0_i32, %c0_i32_0 : i32, i32, i32
  }
  func.func @transform_1(%arg0: i32) -> (i32, i32, i32) {
    %c0_i32 = arith.constant 0 : i32
    %c0_i32_0 = arith.constant 0 : i32
    %c0_i32_1 = arith.constant 0 : i32
    return %arg0, %c0_i32, %c0_i32_0 : i32, i32, i32
  }
  func.func @transform_2(%arg0: i32) -> (i32, i32, i32) {
    %c0_i32 = arith.constant 0 : i32
    %c0_i32_0 = arith.constant 0 : i32
    %c0_i32_1 = arith.constant 0 : i32
    return %arg0, %c0_i32, %c0_i32_0 : i32, i32, i32
  }
  func.func @transform_3(%arg0: i32) -> (i32, i32) {
    %c0_i32 = arith.constant 0 : i32
    %c0_i32_0 = arith.constant 0 : i32
    %c0_i32_1 = arith.constant 0 : i32
    return %c0_i32, %c0_i32_0 : i32, i32
  }
  func.func @transform_4(%arg0: i32) -> (i32, i32) {
    %c0_i32 = arith.constant 0 : i32
    %c0_i32_0 = arith.constant 0 : i32
    %c0_i32_1 = arith.constant 0 : i32
    return %c0_i32, %c0_i32_0 : i32, i32
  }
  func.func @transform_5(%arg0: i32) -> (i32, i32, i32) {
    %c0_i32 = arith.constant 0 : i32
    %c0_i32_0 = arith.constant 0 : i32
    %c0_i32_1 = arith.constant 0 : i32
    %c0_i32_2 = arith.constant 0 : i32
    return %c0_i32, %c0_i32_0, %c0_i32_1 : i32, i32, i32
  }
  func.func @transform_6(%arg0: i32) -> (i32, i32, i32) {
    %c0_i32 = arith.constant 0 : i32
    %c0_i32_0 = arith.constant 0 : i32
    %c0_i32_1 = arith.constant 0 : i32
    %c0_i32_2 = arith.constant 0 : i32
    return %c0_i32, %c0_i32_0, %c0_i32_1 : i32, i32, i32
  }
  func.func @transform_7(%arg0: i32) -> (i32, i32) {
    %c0_i32 = arith.constant 0 : i32
    %c0_i32_0 = arith.constant 0 : i32
    %c0_i32_1 = arith.constant 0 : i32
    return %c0_i32, %c0_i32_0 : i32, i32
  }
  func.func @transform_8(%arg0: i32) -> (i32, i32) {
    %c0_i32 = arith.constant 0 : i32
    %c0_i32_0 = arith.constant 0 : i32
    %c0_i32_1 = arith.constant 0 : i32
    return %c0_i32, %c0_i32_0 : i32, i32
  }
  func.func @transform_9(%arg0: i32) -> (i32, i32, i32) {
    %c0_i32 = arith.constant 0 : i32
    %c0_i32_0 = arith.constant 0 : i32
    %c0_i32_1 = arith.constant 0 : i32
    return %arg0, %c0_i32, %c0_i32_0 : i32, i32, i32
  }
}

</mosaic_0001>

<bundles_post_ra>
// kernel: flexible_gnn_forward.1
= control target key start
LH: loop header
LB: loop body
LE: loop exit
PB: predicated region body
PF: predicated region fallthrough
CT: control target
= control target key end

     0   :  { %14 = vsyncpa [#allocation3], 0  ;;  %s2870_s0 = inlined_call_operand.vmem [shape: bf16[2,256,8], index: 0, kind: input, shape index: {}]   ;;  %s2871_s1 = inlined_call_operand.hbm [shape: f32[2,256,256], index: 1, kind: input, shape index: {}]   ;;  %s2872_s2 = inlined_call_operand.vmem [shape: f32[2,16,256], index: 2, kind: input, shape index: {}]   ;;  %s2873_s3 = inlined_call_operand.vmem [shape: bf16[8,32], index: 3, kind: input, shape index: {}]   ;;  %s2874_s4 = inlined_call_operand.vmem [shape: f32[1,32], index: 4, kind: input, shape index: {}]   ;;  %s2875_s5 = inlined_call_operand.vmem [shape: bf16[2,32,32], index: 5, kind: input, shape index: {}]   ;;  %s2876_s6 = inlined_call_operand.vmem [shape: f32[2,1,32], index: 6, kind: input, shape index: {}]   ;;  %s2877_s7 = inlined_call_operand.vmem [shape: bf16[32,128], index: 7, kind: input, shape index: {}]   ;;  %s2878_s8 = inlined_call_operand.vmem [shape: f32[1,128], index: 8, kind: input, shape index: {}]   ;;  %s2879_s9 = inlined_call_operand.vmem [shape: f32[2,16,128], index: 9, kind: output, shape index: {}]  }
   0x1   :  { %16 = vsyncpa [#allocation3 + $0x1], 0  ;;  %s2131_s30 = smov 0   ;;  %s2133_s10 = smov 0  }
   0x2   :  { %s2135_s11 = smov 0   ;;  %s2137_s12 = smov 0  }
   0x3 LB: > { %s2150_s13 = sadd.s32 4294967295, %s2077_s12   ;;  %s2153_s14 = sadd.s32 1, %s2077_s12   ;;  %s2077_s12 = sphi %s2137_s12, %s2982_s12   ;;  %s2073_s11 = sphi %s2135_s11, %s2981_s11   ;;  %s2069_s10 = sphi %s2133_s10, %s2980_s10   ;;  %s2065_s30 = sphi %s2131_s30, %s2979_s30  }
   0x4   : > { %s52_s15 = ssub.s32 %s2077_s12, %s2153_s14  ;;  %s55_s16 = sadd.s32 1, %s2073_s11 }
   0x5   : > { %p53_p0 = scmp.eq.s32.totalorder %s52_s15, 0  ;;  %p62_p1 = scmp.ne.s32.totalorder %s2073_s11, %s2069_s10 }
   0x6   : > { %p63_p2 = scmp.eq.s32.totalorder %s2077_s12, 0  ;;  %p68_p3 = scmp.ne.s32.totalorder %s2069_s10, %s2065_s30 }
   0x7   : > { %s2163_s17 = scalar_select %p53_p0, %s2073_s11, %s55_s16  }
   0x8   : > { %p2165_p4 = por %p63_p2, %p62_p1  ;;  %p69_p5 = scmp.eq.s32.totalorder %s2150_s13, 0 }
   0x9   : > { %p1974_p6 = scmp.lt.s32.totalorder %s2077_s12, 2  ;;  %s296_s20 = sand.u32 1, %s2073_s11  }
   0xa   : > { %p2171_p7 = por %p69_p5, %p68_p3  ;;  %s1768_s21 = sshll.u32 %s296_s20, 9 }
   0xb   : > { %s1923_s22 = sshll.u32 %s2077_s12, 9  ;;  %s300_s26 = scalar_lea.vmem [#allocation2], %s1768_s21 }
   0xc   : > { %s305_s25 = scalar_lea.hbm %s2871_s1, %s1923_s22  ;;  %s308_s27 = sshll.u32 %s300_s26, 4  ;;  %s309_s27 = int_to_ptr.vmem [resolvable:$true] %s308_s27 }
   0xd   : > { %s306_s28 = sshll.u32 %s305_s25, 4  ;;  %p2182_p8 = pnand %p1974_p6, %p2165_p4  ;;  %s307_s28 = int_to_ptr.hbm [resolvable:$true] %s306_s28 }
   0xe   : > { %p1771_p9 = scmp.ge.s32.totalorder %s2077_s12, 1  ;;  %s297_s30 = scalar_lea.sflag [#allocation3], %s296_s20 }
   0xf   : > { %s2013_s15 = sshra.s32 %s307_s28, 4  ;;  %p2017_p11 = pneg %p2182_p8  ;;  %s2014_s15 = int_to_ptr.hbm [resolvable:$true] %s2013_s15 }
  0x10   : > { %s2015_s16 = scalar_lea.hbm %s2014_s15, 512  ;;  %s2020_s23 = scalar_lea.hbm %s2871_s1, 1024 }
  0x11   : > { %p2016_p10 = scmp.ne.s32.totalorder %s2014_s15, %s2015_s16  ;;  %p2021_p0 = scmp.lt.s32.totalorder %s2014_s15, %s2871_s1 }
  0x12   : > { %p2022_p1 = scmp.lt.s32.totalorder %s2020_s23, %s2015_s16 }
  0x13   : > { %p2018_p12 = pnand %p2017_p11, %p2016_p10 }
  0x14   : > { %p2023_p2 = por %p2022_p1, %p2021_p0 }
  0x15   : > { %p2019_p13 = pneg %p2018_p12 }
  0x17   : > { %p2024_p3 = pnand %p2023_p2, %p2019_p13 }
  0x19   : > { %2027 = shalt.err (!%p2024_p3)
}
  0x1a   : > { %s2079_s20 = smov 256   ;;  %s2080_s25 = smov 16  }
  0x1b   : > { %1973 = dma.hbm_to_vmem [thread:$0]  (!%p2182_p8), %s307_s28, 8192, %s309_s27, %s297_s30, %s2079_s20, %s2079_s20, %s2080_s25  }
  0x1c   : > { %p324_p4 = scmp.lt.s32.totalorder %s2077_s12, 3 }
  0x1e   : > { %p325_p5 = pnand %p1771_p9, %p324_p4 }
  0x20   : > { %328 = sbr.rel (%p325_p5) target bundleno = 1803 (0x70b), region = 56 }
  0x25   : > { %s330_s26 = sand.u32 1, %s2069_s10  }
  0x26   : > { %s1772_s21 = sshll.u32 %s330_s26, 9  ;;  %s331_s15 = scalar_lea.sflag [#allocation3], %s330_s26 }
  0x27   : > { %s2201_s16 = scalar_lea.vmem [#allocation2], %s1772_s21 }
  0x28   : > { %2060 = dma.done.wait (%p2171_p7), %s331_s15, 8192  }
  0x29   : > { %2062 = vsyncadd (%p2171_p7), %s331_s15, 4294959104  ;;  %p380_p6 = scmp.lt.s32.totalorder %s2150_s13, 1  ;;  %vm630_vm0 = vcmask 1043456   ;;  %v496_v0 = vld [vmem:[%s2873_s3] sm:$0xf]  ;;  %vm581_vm1 = vcmask 64512  }
  0x2a   : > { %v632_v1 = vsel %vm630_vm0, %v496_v0, 0  ;;  %v1944_v9 = vld [vmem:[%s2875_s5 + $0x8] sm:$0xff]  ;;  %v1943_v11 = vld [vmem:[%s2875_s5] sm:$0xff]  ;;  %vm755_vm2 = vcmask 261120  }
  0x2b   : > { %s2984_s13 = smov (!%p380_p6, %s2150_s13), 1  ;;  %641 = vmatpush.bf16.msra.mxu0 %v632_v1  ;;  %1949 = vmatpush.bf16.msra.mxu3 %v632_v1  ;;  %v2251_v16 = vld [vmem:[%s2874_s4] ss:$0 sm:$0xff] }
  0x2c   : > { %s1924_s12 = sshll.u32 %s2984_s13, 7  ;;  %810 = vmatpush.bf16.msra.mxu1 %v1944_v9  ;;  %s1925_s30 = sshll.u32 %s2984_s13, 5 }
  0x2d   : > { %s2215_s29 = scalar_lea.vmem %s2870_s0, %s1924_s12  ;;  %s2824_s23 = scalar_lea.vmem %s2872_s2, %s1925_s30 }
  0x2e   : > { %v1927_v2 = vld [vmem:[%s2215_s29] sm:$0xff]  ;;  %v1928_v3 = vld [vmem:[%s2215_s29 + $0x8] sm:$0xff]  ;;  %v1929_v4 = vld [vmem:[%s2215_s29 + $0x10] sm:$0xff]  ;;  %s1926_s26 = sshll.u32 %s2984_s13, 4 }
  0x2f   : > { %1843 = vmatmul.msk.bf16.vlgmr.msra.gmra.mxu0 %vm581_vm1, %v1927_v2  ;;  %v1930_v5 = vld [vmem:[%s2215_s29 + $0x18] sm:$0xff]  ;;  %v1931_v6 = vld [vmem:[%s2215_s29 + $0x20] sm:$0xff]  ;;  %v1932_v7 = vld [vmem:[%s2215_s29 + $0x28] sm:$0xff]  ;;  %1950 = vmatpush.bf16.msrb.mxu3 %v1944_v9  ;;  %s394_s28 = scalar_lea.vmem %s2879_s9, %s1926_s26 }
  0x30   : > { %v1933_v8 = vld [vmem:[%s2215_s29 + $0x30] sm:$0xff]  ;;  %811 = vmatpush.bf16.msra.mxu1 %v1943_v11  ;;  %v1934_v12 = vld [vmem:[%s2215_s29 + $0x38] sm:$0xff]  ;;  %v1935_v14 = vld [vmem:[%s2215_s29 + $0x40] sm:$0xff] }
  0x31   : > { %v1941_v10 = vld [vmem:[%s2215_s29 + $0x70] sm:$0xff]  ;;  %v1942_v13 = vld [vmem:[%s2215_s29 + $0x78] sm:$0xff]  ;;  %v1936_v21 = vld [vmem:[%s2215_s29 + $0x48] sm:$0xff] }
  0x32   : > { %1857 = vmatmul.msk.bf16.vlgmr.msra.gmra.mxu3 %vm581_vm1, %v1941_v10  ;;  %v1937_v27 = vld [vmem:[%s2215_s29 + $0x50] sm:$0xff]  ;;  %v1938_v33 = vld [vmem:[%s2215_s29 + $0x58] sm:$0xff]  ;;  %v1939_v39 = vld [vmem:[%s2215_s29 + $0x60] sm:$0xff] }
  0x33   : > { %1951 = vmatpush.bf16.msrb.mxu3 %v1943_v11  ;;  %v1940_v45 = vld [vmem:[%s2215_s29 + $0x68] sm:$0xff] }
  0x3f   : > { %1844 = vmatmul.msk.bf16.gmra.mxu0 %vm581_vm1, %v1928_v3 }
  0x42   : > { %1858 = vmatmul.msk.bf16.gmra.mxu3 %vm581_vm1, %v1942_v13 }
  0x4f   : > { %1845 = vmatmul.msk.bf16.gmra.mxu0 %vm581_vm1, %v1929_v4 }
  0x5f   : > { %1846 = vmatmul.msk.bf16.gmra.mxu0 %vm581_vm1, %v1930_v5 }
  0x6f   : > { %1847 = vmatmul.msk.bf16.gmra.mxu0 %vm581_vm1, %v1931_v6 }
  0x7f   : > { %1848 = vmatmul.msk.bf16.gmra.mxu0 %vm581_vm1, %v1932_v7 }
  0x8f   : > { %1849 = vmatmul.msk.bf16.gmra.mxu0 %vm581_vm1, %v1933_v8 }
  0x9f   : > { %1850 = vmatmul.msk.bf16.gmra.mxu0 %vm581_vm1, %v1934_v12 }
  0xac   : > { %v643_v15 = vpop.f32.mrf.mxu0 }
  0xad   : > { %v644_v18 = vadd.f32 %v2251_v16, %v643_v15 }
  0xaf   : > { %1851 = vmatmul.msk.bf16.gmra.mxu0 %vm581_vm1, %v1935_v14 }
  0xb4   : > { %v645_v17 = vpop.f32.mrf.mxu0 }
  0xb5   : > { %v646_v19 = vadd.f32 %v2251_v16, %v645_v17  ;;  %v713_v56 = vpop.f32.mrf.mxu3 }
  0xb6   : > { %v714_v58 = vadd.f32 %v2251_v16, %v713_v56 }
  0xb7   : > { %v723_v20 = vpack.c.bf16 %v646_v19, %v644_v18 }
  0xb9   : > { %1867 = vmatmul.msk.bf16.vlgmr.msra.gmra.mxu1 %vm755_vm2, %v723_v20 }
  0xbc   : > { %v648_v22 = vpop.f32.mrf.mxu0 }
  0xbd   : > { %v649_v24 = vadd.f32 %v2251_v16, %v648_v22  ;;  %v715_v59 = vpop.f32.mrf.mxu3 }
  0xbe   : > { %v716_v60 = vadd.f32 %v2251_v16, %v715_v59 }
  0xbf   : > { %1852 = vmatmul.msk.bf16.gmra.mxu0 %vm581_vm1, %v1936_v21 }
  0xc0   : > { %v737_v61 = vpack.c.bf16 %v716_v60, %v714_v58  ;;  %v2332_v60 = vld [vmem:[%s2201_s16 + $0x190] sm:$0xff] }
  0xc1   : > { %2915 = vst [vmem:[#allocation5_spill] sm:$0xff] %v2332_v60 }
  0xc2   : > { %1881 = vmatmul.msk.bf16.vlgmr.msrb.gmra.mxu3 %vm755_vm2, %v737_v61 }
  0xc4   : > { %v650_v23 = vpop.f32.mrf.mxu0 }
  0xc5   : > { %v651_v25 = vadd.f32 %v2251_v16, %v650_v23  ;;  %v718_v2 = vpop.f32.mrf.mxu3 }
  0xc6   : > { %v719_v4 = vadd.f32 %v2251_v16, %v718_v2  ;;  %v2344_v2 = vld [vmem:[%s2201_s16 + $0x1c0] sm:$0xff] }
  0xc7   : > { %v724_v26 = vpack.c.bf16 %v651_v25, %v649_v24  ;;  %2918 = vst [vmem:[#allocation8_spill] sm:$0xff] %v2344_v2 }
  0xc9   : > { %1868 = vmatmul.msk.bf16.gmra.mxu1 %vm755_vm2, %v724_v26 }
  0xcc   : > { %v653_v28 = vpop.f32.mrf.mxu0 }
  0xcd   : > { %v654_v30 = vadd.f32 %v2251_v16, %v653_v28  ;;  %v720_v5 = vpop.f32.mrf.mxu3 }
  0xce   : > { %v721_v6 = vadd.f32 %v2251_v16, %v720_v5 }
  0xcf   : > { %1853 = vmatmul.msk.bf16.gmra.mxu0 %vm581_vm1, %v1937_v27 }
  0xd0   : > { %v738_v7 = vpack.c.bf16 %v721_v6, %v719_v4  ;;  %v2348_v4 = vld [vmem:[%s2201_s16 + $0x1d0] sm:$0xff]  ;;  %v2352_v6 = vld [vmem:[%s2201_s16 + $0x1e0] sm:$0xff] }
  0xd1   : > { %2919 = vst [vmem:[#allocation9_spill] sm:$0xff] %v2348_v4 }
  0xd2   : > { %1882 = vmatmul.msk.bf16.gmra.mxu3 %vm755_vm2, %v738_v7  ;;  %2920 = vst [vmem:[#allocation10_spill] sm:$0xff] %v2352_v6 }
  0xd4   : > { %v655_v29 = vpop.f32.mrf.mxu0 }
  0xd5   : > { %v656_v31 = vadd.f32 %v2251_v16, %v655_v29 }
  0xd7   : > { %v725_v32 = vpack.c.bf16 %v656_v31, %v654_v30 }
  0xd9   : > { %1869 = vmatmul.msk.bf16.gmra.mxu1 %vm755_vm2, %v725_v32 }
  0xdc   : > { %v658_v34 = vpop.f32.mrf.mxu0 }
  0xdd   : > { %v659_v36 = vadd.f32 %v2251_v16, %v658_v34 }
  0xdf   : > { %1854 = vmatmul.msk.bf16.gmra.mxu0 %vm581_vm1, %v1938_v33 }
  0xe4   : > { %v660_v35 = vpop.f32.mrf.mxu0 }
  0xe5   : > { %v661_v37 = vadd.f32 %v2251_v16, %v660_v35 }
  0xe7   : > { %v726_v38 = vpack.c.bf16 %v661_v37, %v659_v36 }
  0xe9   : > { %1870 = vmatmul.msk.bf16.gmra.mxu1 %vm755_vm2, %v726_v38 }
  0xec   : > { %v663_v40 = vpop.f32.mrf.mxu0 }
  0xed   : > { %v664_v42 = vadd.f32 %v2251_v16, %v663_v40 }
  0xef   : > { %1855 = vmatmul.msk.bf16.gmra.mxu0 %vm581_vm1, %v1939_v39 }
  0xf4   : > { %v665_v41 = vpop.f32.mrf.mxu0 }
  0xf5   : > { %v666_v43 = vadd.f32 %v2251_v16, %v665_v41 }
  0xf7   : > { %v727_v44 = vpack.c.bf16 %v666_v43, %v664_v42 }
  0xf9   : > { %1871 = vmatmul.msk.bf16.gmra.mxu1 %vm755_vm2, %v727_v44 }
  0xfc   : > { %v668_v46 = vpop.f32.mrf.mxu0 }
  0xfd   : > { %v669_v48 = vadd.f32 %v2251_v16, %v668_v46 }
  0xff   : > { %1856 = vmatmul.msk.bf16.gmra.mxu0 %vm581_vm1, %v1940_v45 }
 0x104   : > { %v670_v47 = vpop.f32.mrf.mxu0 }
 0x105   : > { %v671_v49 = vadd.f32 %v2251_v16, %v670_v47 }
 0x107   : > { %v728_v50 = vpack.c.bf16 %v671_v49, %v669_v48 }
 0x109   : > { %1872 = vmatmul.msk.bf16.gmra.mxu1 %vm755_vm2, %v728_v50 }
 0x10c   : > { %v673_v51 = vpop.f32.mrf.mxu0 }
 0x10d   : > { %v674_v53 = vadd.f32 %v2251_v16, %v673_v51 }
 0x114   : > { %v675_v52 = vpop.f32.mrf.mxu0 }
 0x115   : > { %v676_v54 = vadd.f32 %v2251_v16, %v675_v52 }
 0x117   : > { %v729_v55 = vpack.c.bf16 %v676_v54, %v674_v53 }
 0x119   : > { %1873 = vmatmul.msk.bf16.gmra.mxu1 %vm755_vm2, %v729_v55 }
 0x11c   : > { %v678_v57 = vpop.f32.mrf.mxu0 }
 0x11d   : > { %v679_v63 = vadd.f32 %v2251_v16, %v678_v57 }
 0x124   : > { %v680_v62 = vpop.f32.mrf.mxu0 }
 0x125   : > { %v681_v0 = vadd.f32 %v2251_v16, %v680_v62  ;;  %v2336_v62 = vld [vmem:[%s2201_s16 + $0x1a0] sm:$0xff] }
 0x126   : > { %2916 = vst [vmem:[#allocation6_spill] sm:$0xff] %v2336_v62 }
 0x127   : > { %v730_v1 = vpack.c.bf16 %v681_v0, %v679_v63  ;;  %v2340_v0 = vld [vmem:[%s2201_s16 + $0x1b0] sm:$0xff] }
 0x128   : > { %2917 = vst [vmem:[#allocation7_spill] sm:$0xff] %v2340_v0 }
 0x129   : > { %1874 = vmatmul.msk.bf16.gmra.mxu1 %vm755_vm2, %v730_v1 }
 0x12c   : > { %v683_v3 = vpop.f32.mrf.mxu0 }
 0x12d   : > { %v684_v9 = vadd.f32 %v2251_v16, %v683_v3 }
 0x134   : > { %v685_v8 = vpop.f32.mrf.mxu0 }
 0x135   : > { %v686_v10 = vadd.f32 %v2251_v16, %v685_v8  ;;  %v2356_v8 = vld [vmem:[%s2201_s16 + $0x1f0] sm:$0xff] }
 0x136   : > { %v2295_v11 = vpop.f32.mrf.mxu1  ;;  %2921 = vst [vmem:[#allocation11_spill] sm:$0xff] %v2356_v8 }
 0x137   : > { %v731_v12 = vpack.c.bf16 %v686_v10, %v684_v9  ;;  %v2360_v10 = vld [vmem:[%s2201_s16] sm:$0xff] }
 0x139   : > { %1875 = vmatmul.msk.bf16.gmra.mxu1 %vm755_vm2, %v731_v12  ;;  %v2364_v12 = vld [vmem:[%s2201_s16 + $0x10] sm:$0xff] }
 0x13c   : > { %v688_v13 = vpop.f32.mrf.mxu0 }
 0x13d   : > { %v689_v17 = vadd.f32 %v2251_v16, %v688_v13 }
 0x13e   : > { %v2298_v14 = vpop.f32.mrf.mxu1 }
 0x144   : > { %v690_v15 = vpop.f32.mrf.mxu0 }
 0x145   : > { %v691_v18 = vadd.f32 %v2251_v16, %v690_v15  ;;  %v883_v53 = vpop.f32.mrf.mxu3  ;;  %v2372_v15 = vld [vmem:[%s2201_s16 + $0x30] sm:$0xff] }
 0x146   : > { %v2302_v19 = vpop.f32.mrf.mxu1 }
 0x147   : > { %v732_v20 = vpack.c.bf16 %v691_v18, %v689_v17  ;;  %v2376_v17 = vld [vmem:[%s2201_s16 + $0x40] sm:$0xff]  ;;  %v2380_v18 = vld [vmem:[%s2201_s16 + $0x8] sm:$0xff] }
 0x149   : > { %1876 = vmatmul.msk.bf16.gmra.mxu1 %vm755_vm2, %v732_v20  ;;  %v2389_v20 = vld [vmem:[%s2201_s16 + $0x18] sm:$0xff] }
 0x14c   : > { %v693_v21 = vpop.f32.mrf.mxu0 }
 0x14d   : > { %v694_v24 = vadd.f32 %v2251_v16, %v693_v21  ;;  %v2394_v21 = vld [vmem:[%s2201_s16 + $0x60] sm:$0xff] }
 0x14e   : > { %v2305_v22 = vpop.f32.mrf.mxu1 }
 0x154   : > { %v695_v23 = vpop.f32.mrf.mxu0 }
 0x155   : > { %v696_v25 = vadd.f32 %v2251_v16, %v695_v23  ;;  %v2402_v23 = vld [vmem:[%s2201_s16 + $0x70] sm:$0xff] }
 0x156   : > { %v823_v26 = vpop.f32.mrf.mxu1 }
 0x157   : > { %v733_v27 = vpack.c.bf16 %v696_v25, %v694_v24  ;;  %v2405_v24 = vld [vmem:[%s2201_s16 + $0x38] sm:$0xff]  ;;  %v2410_v25 = vld [vmem:[%s2201_s16 + $0x80] sm:$0xff] }
 0x159   : > { %1877 = vmatmul.msk.bf16.gmra.mxu1 %vm755_vm2, %v733_v27  ;;  %v2418_v27 = vld [vmem:[%s2201_s16 + $0x90] sm:$0xff] }
 0x15c   : > { %v698_v28 = vpop.f32.mrf.mxu0 }
 0x15d   : > { %v699_v31 = vadd.f32 %v2251_v16, %v698_v28  ;;  %v2421_v28 = vld [vmem:[%s2201_s16 + $0x58] sm:$0xff] }
 0x15e   : > { %v825_v29 = vpop.f32.mrf.mxu1 }
 0x164   : > { %v700_v30 = vpop.f32.mrf.mxu0 }
 0x165   : > { %v701_v32 = vadd.f32 %v2251_v16, %v700_v30  ;;  %v2429_v30 = vld [vmem:[%s2201_s16 + $0x68] sm:$0xff] }
 0x166   : > { %v828_v33 = vpop.f32.mrf.mxu1 }
 0x167   : > { %v734_v34 = vpack.c.bf16 %v701_v32, %v699_v31  ;;  %v2434_v31 = vld [vmem:[%s2201_s16 + $0xb0] sm:$0xff]  ;;  %v2437_v32 = vld [vmem:[%s2201_s16 + $0x78] sm:$0xff] }
 0x169   : > { %1878 = vmatmul.msk.bf16.gmra.mxu1 %vm755_vm2, %v734_v34  ;;  %v2445_v34 = vld [vmem:[%s2201_s16 + $0xc0] sm:$0xff] }
 0x16c   : > { %v703_v35 = vpop.f32.mrf.mxu0 }
 0x16d   : > { %v704_v38 = vadd.f32 %v2251_v16, %v703_v35  ;;  %v2448_v35 = vld [vmem:[%s2201_s16 + $0x88] sm:$0xff] }
 0x16e   : > { %v830_v36 = vpop.f32.mrf.mxu1  ;;  %2922 = vst [vmem:[#allocation12_spill] sm:$0xff] %v2448_v35 }
 0x174   : > { %v705_v37 = vpop.f32.mrf.mxu0 }
 0x175   : > { %v706_v39 = vadd.f32 %v2251_v16, %v705_v37  ;;  %v2455_v37 = vld [vmem:[%s2201_s16 + $0xd0] sm:$0xff] }
 0x176   : > { %v833_v40 = vpop.f32.mrf.mxu1 }
 0x177   : > { %v735_v41 = vpack.c.bf16 %v706_v39, %v704_v38  ;;  %v2458_v38 = vld [vmem:[%s2201_s16 + $0x98] sm:$0xff] }
 0x178   : > { %2923 = vst [vmem:[#allocation13_spill] sm:$0xff] %v2458_v38 }
 0x179   : > { %1879 = vmatmul.msk.bf16.gmra.mxu1 %vm755_vm2, %v735_v41  ;;  %v2468_v41 = vld [vmem:[%s2201_s16 + $0xa8] sm:$0xff] }
 0x17a   : > { %2924 = vst [vmem:[#allocation14_spill] sm:$0xff] %v2468_v41 }
 0x17c   : > { %v708_v42 = vpop.f32.mrf.mxu0 }
 0x17d   : > { %v709_v45 = vadd.f32 %v2251_v16, %v708_v42 }
 0x17e   : > { %v835_v43 = vpop.f32.mrf.mxu1 }
 0x184   : > { %v710_v44 = vpop.f32.mrf.mxu0 }
 0x185   : > { %v711_v46 = vadd.f32 %v2251_v16, %v710_v44  ;;  %v885_v16 = vpop.f32.mrf.mxu3  ;;  %v2478_v44 = vld [vmem:[%s2201_s16 + $0xb8] sm:$0xff] }
 0x186   : > { %v838_v47 = vpop.f32.mrf.mxu1  ;;  %2925 = vst [vmem:[#allocation15_spill] sm:$0xff] %v2478_v44 }
 0x187   : > { %v736_v48 = vpack.c.bf16 %v711_v46, %v709_v45  ;;  %v2485_v46 = vld [vmem:[%s2201_s16 + $0x100] sm:$0xff] }
 0x189   : > { %1880 = vmatmul.msk.bf16.gmra.mxu1 %vm755_vm2, %v736_v48 }
 0x18d   : > { %v888_v57 = vpop.f32.mrf.mxu3 }
 0x18e   : > { %v840_v49 = vpop.f32.mrf.mxu1 }
 0x195   : > { %v890_v59 = vpop.f32.mrf.mxu3 }
 0x196   : > { %v843_v50 = vpop.f32.mrf.mxu1 }
 0x19e   : > { %v845_v51 = vpop.f32.mrf.mxu1 }
 0x1a6   : > { %v848_v52 = vpop.f32.mrf.mxu1 }
 0x1ae   : > { %v850_v54 = vpop.f32.mrf.mxu1 }
 0x1af   : > { %897 = vmatpush.msra.mxu2 %v850_v54  ;;  %1952 = vmatpush.msra.mxu3 %v850_v54  ;;  %v2506_v54 = vld [vmem:[%s2201_s16 + $0x120] sm:$0xff] }
 0x1b1   : > { %898 = vmatpush.msra.mxu2 %v848_v52  ;;  %1953 = vmatpush.msra.mxu3 %v848_v52 }
 0x1b3   : > { %899 = vmatpush.msra.mxu2 %v845_v51  ;;  %1954 = vmatpush.msra.mxu3 %v845_v51  ;;  %v2498_v51 = vld [vmem:[%s2201_s16 + $0x110] sm:$0xff] }
 0x1b5   : > { %900 = vmatpush.msra.mxu2 %v843_v50  ;;  %1955 = vmatpush.msra.mxu3 %v843_v50 }
 0x1b6   : > { %v2319_v55 = vpop.f32.mrf.mxu1 }
 0x1b7   : > { %901 = vmatpush.msra.mxu2 %v840_v49  ;;  %1956 = vmatpush.msra.mxu3 %v840_v49  ;;  %v2493_v49 = vld [vmem:[%s2201_s16 + $0xd8] sm:$0xff] }
 0x1b8   : > { %2927 = vst [vmem:[#allocation17_spill] sm:$0xff] %v2493_v49 }
 0x1b9   : > { %902 = vmatpush.msra.mxu2 %v838_v47  ;;  %1957 = vmatpush.msra.mxu3 %v838_v47  ;;  %v2488_v47 = vld [vmem:[%s2201_s16 + $0xc8] sm:$0xff] }
 0x1ba   : > { %2926 = vst [vmem:[#allocation16_spill] sm:$0xff] %v2488_v47 }
 0x1bb   : > { %903 = vmatpush.msra.mxu2 %v835_v43  ;;  %1958 = vmatpush.msra.mxu3 %v835_v43  ;;  %v2475_v43 = vld [vmem:[%s2201_s16 + $0xf0] sm:$0xff] }
 0x1bd   : > { %904 = vmatpush.msra.mxu2 %v833_v40  ;;  %1959 = vmatpush.msra.mxu3 %v833_v40  ;;  %v2465_v40 = vld [vmem:[%s2201_s16 + $0xe0] sm:$0xff] }
 0x1be   : > { %v2321_v56 = vpop.f32.mrf.mxu1 }
 0x1bf   : > { %905 = vmatpush.msra.mxu2 %v830_v36  ;;  %1960 = vmatpush.msra.mxu3 %v830_v36 }
 0x1c1   : > { %906 = vmatpush.msra.mxu2 %v828_v33  ;;  %1961 = vmatpush.msra.mxu3 %v828_v33  ;;  %v1946_v33 = vld [vmem:[%s2875_s5 + $0x18] sm:$0xff] }
 0x1c2   : > { %1242 = vmatpush.bf16.msrb.mxu0 %v1946_v33 }
 0x1c3   : > { %907 = vmatpush.msra.mxu2 %v825_v29  ;;  %1962 = vmatpush.msra.mxu3 %v825_v29  ;;  %v2426_v29 = vld [vmem:[%s2201_s16 + $0xa0] sm:$0xff] }
 0x1c5   : > { %908 = vmatpush.msra.mxu2 %v823_v26  ;;  %1963 = vmatpush.msra.mxu3 %v823_v26  ;;  %v2413_v26 = vld [vmem:[%s2201_s16 + $0x48] sm:$0xff] }
 0x1c6   : > { %v858_v58 = vpop.f32.mrf.mxu1 }
 0x1c7   : > { %909 = vmatpush.msra.mxu2 %v2305_v22  ;;  %1964 = vmatpush.msra.mxu3 %v2305_v22  ;;  %v2397_v22 = vld [vmem:[%s2201_s16 + $0x28] sm:$0xff] }
 0x1c9   : > { %910 = vmatpush.msra.mxu2 %v2302_v19  ;;  %1965 = vmatpush.msra.mxu3 %v2302_v19  ;;  %v2386_v19 = vld [vmem:[%s2201_s16 + $0x50] sm:$0xff] }
 0x1cb   : > { %911 = vmatpush.msra.mxu2 %v2298_v14  ;;  %1966 = vmatpush.msra.mxu3 %v2298_v14  ;;  %v2368_v14 = vld [vmem:[%s2201_s16 + $0x20] sm:$0xff] }
 0x1cd   : > { %912 = vmatpush.msra.mxu2 %v2295_v11  ;;  %1967 = vmatpush.msra.mxu3 %v2295_v11 }
 0x1ce   : > { %v860_v61 = vpop.f32.mrf.mxu1  ;;  %988 = vmatmul.f32.vlgmr.msra.gmra.mxu3 %v2332_v60  ;;  %913 = vmatmul.f32.vlgmr.msra.gmra.mxu2 %v2360_v10 }
 0x1cf   : > { %1010 = vmatpush.msrb.mxu3 %v890_v59 }
 0x1d1   : > { %1011 = vmatpush.msrb.mxu3 %v888_v57  ;;  %v2516_v57 = vld [vmem:[%s2201_s16 + $0xf8] sm:$0xff] }
 0x1d2   : > { %2929 = vst [vmem:[#allocation19_spill] sm:$0xff] %v2516_v57 }
 0x1d3   : > { %1012 = vmatpush.msrb.mxu3 %v885_v16 }
 0x1d5   : > { %1013 = vmatpush.msrb.mxu3 %v883_v53  ;;  %v2503_v53 = vld [vmem:[%s2201_s16 + $0xe8] sm:$0xff] }
 0x1d6   : > { %v863_v63 = vpop.f32.mrf.mxu1  ;;  %991 = vmatmul.f32.gmra.mxu3 %v2336_v62  ;;  %916 = vmatmul.f32.gmra.mxu2 %v2364_v12  ;;  %2928 = vst [vmem:[#allocation18_spill] sm:$0xff] %v2503_v53 }
 0x1de   : > { %v865_v1 = vpop.f32.mrf.mxu1  ;;  %994 = vmatmul.f32.gmra.mxu3 %v2340_v0  ;;  %919 = vmatmul.f32.gmra.mxu2 %v2368_v14 }
 0x1e6   : > { %v868_v3 = vpop.f32.mrf.mxu1  ;;  %997 = vmatmul.f32.gmra.mxu3 %v2344_v2  ;;  %922 = vmatmul.f32.gmra.mxu2 %v2372_v15  ;;  %v2552_v2 = vld [vmem:[%s2201_s16 + $0x160] sm:$0xff] }
 0x1ee   : > { %v870_v5 = vpop.f32.mrf.mxu1  ;;  %1000 = vmatmul.f32.gmra.mxu3 %v2348_v4  ;;  %925 = vmatmul.f32.gmra.mxu2 %v2376_v17 }
 0x1f6   : > { %v873_v7 = vpop.f32.mrf.mxu1  ;;  %1003 = vmatmul.f32.gmra.mxu3 %v2352_v6  ;;  %928 = vmatmul.f32.gmra.mxu2 %v2386_v19 }
 0x1fe   : > { %v875_v9 = vpop.f32.mrf.mxu1  ;;  %1006 = vmatmul.f32.gmra.mxu3 %v2356_v8  ;;  %931 = vmatmul.f32.gmra.mxu2 %v2394_v21 }
 0x206   : > { %v878_v11 = vpop.f32.mrf.mxu1  ;;  %934 = vmatmul.f32.gmra.mxu2 %v2402_v23 }
 0x20e   : > { %v880_v13 = vpop.f32.mrf.mxu1  ;;  %937 = vmatmul.f32.gmra.mxu2 %v2410_v25 }
 0x20f   : > { %1014 = vmatpush.msrb.mxu3 %v880_v13 }
 0x211   : > { %1015 = vmatpush.msrb.mxu3 %v878_v11  ;;  %v2542_v11 = vld [vmem:[%s2201_s16 + $0x150] sm:$0xff] }
 0x213   : > { %1016 = vmatpush.msrb.mxu3 %v875_v9  ;;  %v2539_v9 = vld [vmem:[%s2201_s16 + $0x118] sm:$0xff] }
 0x214   : > { %2931 = vst [vmem:[#allocation21_spill] sm:$0xff] %v2539_v9 }
 0x215   : > { %1017 = vmatpush.msrb.mxu3 %v873_v7  ;;  %v2536_v7 = vld [vmem:[%s2876_s6] ss:$0 sm:$0xff] }
 0x216   : > { %940 = vmatmul.f32.gmra.mxu2 %v2418_v27 }
 0x217   : > { %1018 = vmatpush.msrb.mxu3 %v870_v5 }
 0x219   : > { %1019 = vmatpush.msrb.mxu3 %v868_v3 }
 0x21b   : > { %1020 = vmatpush.msrb.mxu3 %v865_v1  ;;  %v2529_v1 = vld [vmem:[%s2201_s16 + $0x140] sm:$0xff] }
 0x21d   : > { %1021 = vmatpush.msrb.mxu3 %v863_v63  ;;  %v2526_v63 = vld [vmem:[%s2201_s16 + $0x108] sm:$0xff] }
 0x21e   : > { %943 = vmatmul.f32.gmra.mxu2 %v2426_v29  ;;  %2930 = vst [vmem:[#allocation20_spill] sm:$0xff] %v2526_v63 }
 0x21f   : > { %1022 = vmatpush.msrb.mxu3 %v860_v61 }
 0x221   : > { %1023 = vmatpush.msrb.mxu3 %v858_v58  ;;  %v2519_v58 = vld [vmem:[%s2201_s16 + $0x130] sm:$0xff] }
 0x223   : > { %1024 = vmatpush.msrb.mxu3 %v2321_v56 }
 0x225   : > { %1025 = vmatpush.msrb.mxu3 %v2319_v55  ;;  %v1945_v55 = vld [vmem:[%s2875_s5 + $0x10] sm:$0xff] }
 0x226   : > { %1026 = vmatmul.f32.vlgmr.msrb.gmra.mxu3 %v2380_v18  ;;  %946 = vmatmul.f32.gmra.mxu2 %v2434_v31 }
 0x227   : > { %1243 = vmatpush.bf16.msrb.mxu0 %v1945_v55 }
 0x22e   : > { %1029 = vmatmul.f32.gmra.mxu3 %v2389_v20  ;;  %949 = vmatmul.f32.gmra.mxu2 %v2445_v34 }
 0x236   : > { %1032 = vmatmul.f32.gmra.mxu3 %v2397_v22  ;;  %952 = vmatmul.f32.gmra.mxu2 %v2455_v37 }
 0x23e   : > { %1035 = vmatmul.f32.gmra.mxu3 %v2405_v24  ;;  %955 = vmatmul.f32.gmra.mxu2 %v2465_v40 }
 0x246   : > { %1038 = vmatmul.f32.gmra.mxu3 %v2413_v26  ;;  %958 = vmatmul.f32.gmra.mxu2 %v2475_v43 }
 0x24e   : > { %1041 = vmatmul.f32.gmra.mxu3 %v2421_v28  ;;  %961 = vmatmul.f32.gmra.mxu2 %v2485_v46 }
 0x251   : > { %v2450_v36 = vpop.f32.mrf.mxu3  ;;  %v914_v48 = vpop.f32.mrf.mxu2 }
 0x252   : > { %v915_v13 = vadd.f32 %v2536_v7, %v914_v48 }
 0x256   : > { %1044 = vmatmul.f32.gmra.mxu3 %v2429_v30  ;;  %964 = vmatmul.f32.gmra.mxu2 %v2498_v51 }
 0x259   : > { %v2461_v39 = vpop.f32.mrf.mxu3  ;;  %v917_v52 = vpop.f32.mrf.mxu2 }
 0x25a   : > { %v918_v33 = vadd.f32 %v2536_v7, %v917_v52 }
 0x25e   : > { %1047 = vmatmul.f32.gmra.mxu3 %v2437_v32  ;;  %967 = vmatmul.f32.gmra.mxu2 %v2506_v54 }
 0x261   : > { %v2472_v42 = vpop.f32.mrf.mxu3  ;;  %v920_v56 = vpop.f32.mrf.mxu2 }
 0x266   : > { %1050 = vmatmul.f32.gmra.mxu3 %v2448_v35  ;;  %970 = vmatmul.f32.gmra.mxu2 %v2519_v58 }
 0x269   : > { %v2482_v45 = vpop.f32.mrf.mxu3  ;;  %v923_v61 = vpop.f32.mrf.mxu2 }
 0x26e   : > { %1053 = vmatmul.f32.gmra.mxu3 %v2458_v38  ;;  %973 = vmatmul.f32.gmra.mxu2 %v2529_v1 }
 0x271   : > { %v2495_v50 = vpop.f32.mrf.mxu3  ;;  %v926_v3 = vpop.f32.mrf.mxu2 }
 0x276   : > { %1056 = vmatmul.f32.gmra.mxu3 %v2468_v41  ;;  %976 = vmatmul.f32.gmra.mxu2 %v2542_v11 }
 0x279   : > { %v2512_v16 = vpop.f32.mrf.mxu3  ;;  %v929_v55 = vpop.f32.mrf.mxu2 }
 0x27e   : > { %1059 = vmatmul.f32.gmra.mxu3 %v2478_v44  ;;  %979 = vmatmul.f32.gmra.mxu2 %v2552_v2 }
 0x281   : > { %v2523_v59 = vpop.f32.mrf.mxu3 }
 0x286   : > { %1062 = vmatmul.f32.gmra.mxu3 %v2488_v47 }
 0x28e   : > { %1065 = vmatmul.f32.gmra.mxu3 %v2493_v49  ;;  %v2577_v49 = vld [vmem:[%s2201_s16 + $0x158] sm:$0xff] }
 0x28f   : > { %2936 = vst [vmem:[#allocation26_spill] sm:$0xff] %v2577_v49 }
 0x296   : > { %1068 = vmatmul.f32.gmra.mxu3 %v2503_v53 }
 0x29e   : > { %1071 = vmatmul.f32.gmra.mxu3 %v2516_v57 }
 0x2a6   : > { %1074 = vmatmul.f32.gmra.mxu3 %v2526_v63  ;;  %v2549_v63 = vld [vmem:[%s2201_s16 + $0x128] sm:$0xff] }
 0x2a7   : > { %2932 = vst [vmem:[#allocation22_spill] sm:$0xff] %v2549_v63 }
 0x2a9   : > { %v1027_v5 = vpop.f32.mrf.mxu3 }
 0x2aa   : > { %v1028_v8 = vadd.f32 %v1027_v5, %v915_v13  ;;  %v2558_v5 = vld [vmem:[%s2201_s16 + $0x138] sm:$0xff]  ;;  %v921_v13 = vadd.f32 %v2536_v7, %v920_v56 }
 0x2ab   : > { %2933 = vst [vmem:[#allocation23_spill] sm:$0xff] %v2558_v5 }
 0x2ac   : > { %v1123_v57 = vmax.f32 %v1028_v8, 0.0 }
 0x2ae   : > { %1077 = vmatmul.f32.gmra.mxu3 %v2539_v9  ;;  %v932_v9 = vpop.f32.mrf.mxu2 }
 0x2b1   : > { %v1030_v6 = vpop.f32.mrf.mxu3 }
 0x2b2   : > { %v1031_v4 = vadd.f32 %v1030_v6, %v918_v33  ;;  %v2561_v6 = vld [vmem:[%s2201_s16 + $0x170] sm:$0xff] }
 0x2b3   : > { %982 = vmatmul.f32.gmra.mxu2 %v2561_v6 }
 0x2b4   : > { %v1124_v0 = vmax.f32 %v1031_v4, 0.0 }
 0x2b6   : > { %v1155_v48 = vpack.c.bf16 %v1124_v0, %v1123_v57  ;;  %1080 = vmatmul.f32.gmra.mxu3 %v2549_v63  ;;  %v924_v0 = vadd.f32 %v2536_v7, %v923_v61  ;;  %v935_v4 = vpop.f32.mrf.mxu2  ;;  %v2568_v63 = vld [vmem:[%s2201_s16 + $0x148] sm:$0xff] }
 0x2b7   : > { %2934 = vst [vmem:[#allocation24_spill] sm:$0xff] %v2568_v63 }
 0x2b8   : > { %1895 = vmatmul.msk.bf16.vlgmr.msrb.gmra.mxu0 %vm755_vm2, %v1155_v48  ;;  %v2571_v48 = vld [vmem:[%s2201_s16 + $0x180] sm:$0xff] }
 0x2b9   : > { %v1033_v52 = vpop.f32.mrf.mxu3  ;;  %2935 = vst [vmem:[#allocation25_spill] sm:$0xff] %v2571_v48 }
 0x2ba   : > { %v1034_v8 = vadd.f32 %v1033_v52, %v921_v13  ;;  %v927_v52 = vadd.f32 %v2536_v7, %v926_v3  ;;  %v930_v13 = vadd.f32 %v2536_v7, %v929_v55  ;;  %v933_v55 = vadd.f32 %v2536_v7, %v932_v9  ;;  %v2599_v9 = vld [vmem:[%s2201_s16 + $0x198] sm:$0xff] }
 0x2bb   : > { %985 = vmatmul.f32.gmra.mxu2 %v2571_v48  ;;  %2940 = vst [vmem:[#allocation30_spill] sm:$0xff] %v2599_v9 }
 0x2bc   : > { %v1125_v53 = vmax.f32 %v1034_v8, 0.0 }
 0x2be   : > { %1083 = vmatmul.f32.gmra.mxu3 %v2558_v5  ;;  %v938_v5 = vpop.f32.mrf.mxu2 }
 0x2c1   : > { %v1036_v57 = vpop.f32.mrf.mxu3 }
 0x2c2   : > { %v1037_v33 = vadd.f32 %v1036_v57, %v924_v0 }
 0x2c4   : > { %v1126_v62 = vmax.f32 %v1037_v33, 0.0 }
 0x2c6   : > { %v1156_v56 = vpack.c.bf16 %v1126_v62, %v1125_v53  ;;  %1086 = vmatmul.f32.gmra.mxu3 %v2568_v63  ;;  %v941_v0 = vpop.f32.mrf.mxu2  ;;  %v2583_v62 = vld [vmem:[%s2201_s16 + $0x168] sm:$0xff] }
 0x2c7   : > { %2937 = vst [vmem:[#allocation27_spill] sm:$0xff] %v2583_v62 }
 0x2c8   : > { %1896 = vmatmul.msk.bf16.gmra.mxu0 %vm755_vm2, %v1156_v56 }
 0x2c9   : > { %v1039_v61 = vpop.f32.mrf.mxu3 }
 0x2ca   : > { %v1040_v8 = vadd.f32 %v1039_v61, %v927_v52  ;;  %v936_v61 = vadd.f32 %v2536_v7, %v935_v4  ;;  %v939_v4 = vadd.f32 %v2536_v7, %v938_v5 }
 0x2cc   : > { %v1127_v53 = vmax.f32 %v1040_v8, 0.0 }
 0x2ce   : > { %1089 = vmatmul.f32.gmra.mxu3 %v2577_v49  ;;  %v944_v3 = vpop.f32.mrf.mxu2  ;;  %v2588_v49 = vld [vmem:[%s2201_s16 + $0x178] sm:$0xff] }
 0x2cf   : > { %2938 = vst [vmem:[#allocation28_spill] sm:$0xff] %v2588_v49 }
 0x2d1   : > { %v1042_v57 = vpop.f32.mrf.mxu3 }
 0x2d2   : > { %v1043_v33 = vadd.f32 %v1042_v57, %v930_v13  ;;  %v2594_v57 = vld [vmem:[%s2201_s16 + $0x188] sm:$0xff] }
 0x2d3   : > { %2939 = vst [vmem:[#allocation29_spill] sm:$0xff] %v2594_v57 }
 0x2d4   : > { %v1128_v63 = vmax.f32 %v1043_v33, 0.0 }
 0x2d6   : > { %v1157_v56 = vpack.c.bf16 %v1128_v63, %v1127_v53  ;;  %1092 = vmatmul.f32.gmra.mxu3 %v2583_v62  ;;  %v947_v63 = vpop.f32.mrf.mxu2 }
 0x2d8   : > { %1897 = vmatmul.msk.bf16.gmra.mxu0 %vm755_vm2, %v1157_v56 }
 0x2d9   : > { %v1045_v60 = vpop.f32.mrf.mxu3 }
 0x2da   : > { %v1046_v52 = vadd.f32 %v1045_v60, %v933_v55  ;;  %v942_v55 = vadd.f32 %v2536_v7, %v941_v0  ;;  %v945_v0 = vadd.f32 %v2536_v7, %v944_v3  ;;  %v2621_v3 = vld [vmem:[%s2201_s16 + $0x1d8] sm:$0xff] }
 0x2db   : > { %2944 = vst [vmem:[#allocation34_spill] sm:$0xff] %v2621_v3 }
 0x2dc   : > { %v1129_v33 = vmax.f32 %v1046_v52, 0.0 }
 0x2de   : > { %1095 = vmatmul.f32.gmra.mxu3 %v2588_v49  ;;  %v950_v60 = vpop.f32.mrf.mxu2  ;;  %v2610_v49 = vld [vmem:[%s2201_s16 + $0x1b8] sm:$0xff] }
 0x2df   : > { %2942 = vst [vmem:[#allocation32_spill] sm:$0xff] %v2610_v49 }
 0x2e1   : > { %v1048_v13 = vpop.f32.mrf.mxu3 }
 0x2e2   : > { %v1049_v8 = vadd.f32 %v1048_v13, %v936_v61 }
 0x2e4   : > { %v1130_v53 = vmax.f32 %v1049_v8, 0.0  ;;  %v2605_v8 = vld [vmem:[%s2201_s16 + $0x1a8] sm:$0xff] }
 0x2e5   : > { %2941 = vst [vmem:[#allocation31_spill] sm:$0xff] %v2605_v8 }
 0x2e6   : > { %v1158_v56 = vpack.c.bf16 %v1130_v53, %v1129_v33  ;;  %1098 = vmatmul.f32.gmra.mxu3 %v2594_v57  ;;  %v953_v57 = vpop.f32.mrf.mxu2 }
 0x2e8   : > { %1898 = vmatmul.msk.bf16.gmra.mxu0 %vm755_vm2, %v1158_v56 }
 0x2e9   : > { %v1051_v62 = vpop.f32.mrf.mxu3 }
 0x2ea   : > { %v1052_v61 = vadd.f32 %v1051_v62, %v939_v4  ;;  %v948_v62 = vadd.f32 %v2536_v7, %v947_v63  ;;  %v951_v63 = vadd.f32 %v2536_v7, %v950_v60 }
 0x2ec   : > { %v1131_v33 = vmax.f32 %v1052_v61, 0.0 }
 0x2ee   : > { %1101 = vmatmul.f32.gmra.mxu3 %v2599_v9  ;;  %v956_v61 = vpop.f32.mrf.mxu2  ;;  %v2632_v9 = vld [vmem:[%s2201_s16 + $0x1f8] sm:$0xff] }
 0x2ef   : > { %2946 = vst [vmem:[#allocation36_spill] sm:$0xff] %v2632_v9  ;;  %v957_v60 = vadd.f32 %v2536_v7, %v956_v61 }
 0x2f1   : > { %v1054_v13 = vpop.f32.mrf.mxu3 }
 0x2f2   : > { %v1055_v52 = vadd.f32 %v1054_v13, %v942_v55 }
 0x2f4   : > { %v1132_v53 = vmax.f32 %v1055_v52, 0.0  ;;  %v2616_v52 = vld [vmem:[%s2201_s16 + $0x1c8] sm:$0xff] }
 0x2f5   : > { %2943 = vst [vmem:[#allocation33_spill] sm:$0xff] %v2616_v52 }
 0x2f6   : > { %v1159_v56 = vpack.c.bf16 %v1132_v53, %v1131_v33  ;;  %1104 = vmatmul.f32.gmra.mxu3 %v2605_v8 }
 0x2f8   : > { %1899 = vmatmul.msk.bf16.gmra.mxu0 %vm755_vm2, %v1159_v56 }
 0x2f9   : > { %v1057_v5 = vpop.f32.mrf.mxu3 }
 0x2fa   : > { %v1058_v4 = vadd.f32 %v1057_v5, %v945_v0  ;;  %v954_v5 = vadd.f32 %v2536_v7, %v953_v57 }
 0x2fc   : > { %v1133_v33 = vmax.f32 %v1058_v4, 0.0 }
 0x2fe   : > { %1107 = vmatmul.f32.gmra.mxu3 %v2610_v49  ;;  %v959_v49 = vpop.f32.mrf.mxu2 }
 0x2ff   : > { %v960_v57 = vadd.f32 %v2536_v7, %v959_v49 }
 0x301   : > { %v1060_v55 = vpop.f32.mrf.mxu3 }
 0x302   : > { %v1061_v13 = vadd.f32 %v1060_v55, %v948_v62  ;;  %v2627_v55 = vld [vmem:[%s2201_s16 + $0x1e8] sm:$0xff] }
 0x303   : > { %2945 = vst [vmem:[#allocation35_spill] sm:$0xff] %v2627_v55 }
 0x304   : > { %v1134_v53 = vmax.f32 %v1061_v13, 0.0 }
 0x306   : > { %v1160_v56 = vpack.c.bf16 %v1134_v53, %v1133_v33  ;;  %1110 = vmatmul.f32.gmra.mxu3 %v2616_v52  ;;  %v962_v53 = vpop.f32.mrf.mxu2 }
 0x308   : > { %1900 = vmatmul.msk.bf16.gmra.mxu0 %vm755_vm2, %v1160_v56 }
 0x309   : > { %v1063_v8 = vpop.f32.mrf.mxu3 }
 0x30a   : > { %v1064_v0 = vadd.f32 %v1063_v8, %v951_v63 }
 0x30c   : > { %v1135_v13 = vmax.f32 %v1064_v0, 0.0 }
 0x30e   : > { %1113 = vmatmul.f32.gmra.mxu3 %v2621_v3  ;;  %v965_v8 = vpop.f32.mrf.mxu2 }
 0x30f   : > { %v966_v3 = vadd.f32 %v2536_v7, %v965_v8 }
 0x311   : > { %v1066_v62 = vpop.f32.mrf.mxu3 }
 0x312   : > { %v1067_v4 = vadd.f32 %v1066_v62, %v954_v5 }
 0x314   : > { %v1136_v33 = vmax.f32 %v1067_v4, 0.0 }
 0x316   : > { %v1161_v56 = vpack.c.bf16 %v1136_v33, %v1135_v13  ;;  %1116 = vmatmul.f32.gmra.mxu3 %v2627_v55  ;;  %v963_v55 = vadd.f32 %v2536_v7, %v962_v53 }
 0x318   : > { %1901 = vmatmul.msk.bf16.gmra.mxu0 %vm755_vm2, %v1161_v56  ;;  %v968_v56 = vpop.f32.mrf.mxu2 }
 0x319   : > { %v1069_v52 = vpop.f32.mrf.mxu3 }
 0x31a   : > { %v1070_v63 = vadd.f32 %v1069_v52, %v957_v60 }
 0x31c   : > { %v1137_v62 = vmax.f32 %v1070_v63, 0.0  ;;  %v969_v63 = vadd.f32 %v2536_v7, %v968_v56 }
 0x31e   : > { %1119 = vmatmul.f32.gmra.mxu3 %v2632_v9 }
 0x320   : > { %v971_v48 = vpop.f32.mrf.mxu2 }
 0x321   : > { %v1072_v5 = vpop.f32.mrf.mxu3  ;;  %v972_v53 = vadd.f32 %v2536_v7, %v971_v48 }
 0x322   : > { %v1073_v0 = vadd.f32 %v1072_v5, %v960_v57 }
 0x324   : > { %v1138_v4 = vmax.f32 %v1073_v0, 0.0 }
 0x326   : > { %v1162_v13 = vpack.c.bf16 %v1138_v4, %v1137_v62 }
 0x328   : > { %1902 = vmatmul.msk.bf16.gmra.mxu0 %vm755_vm2, %v1162_v13  ;;  %v974_v0 = vpop.f32.mrf.mxu2 }
 0x329   : > { %v1075_v33 = vpop.f32.mrf.mxu3 }
 0x32a   : > { %v1076_v61 = vadd.f32 %v1075_v33, %v963_v55  ;;  %v975_v33 = vadd.f32 %v2536_v7, %v974_v0 }
 0x32c   : > { %v1139_v49 = vmax.f32 %v1076_v61, 0.0 }
 0x330   : > { %v977_v13 = vpop.f32.mrf.mxu2 }
 0x331   : > { %v1078_v47 = vpop.f32.mrf.mxu3  ;;  %v978_v61 = vadd.f32 %v2536_v7, %v977_v13 }
 0x332   : > { %v1079_v9 = vadd.f32 %v1078_v47, %v966_v3 }
 0x334   : > { %v1140_v44 = vmax.f32 %v1079_v9, 0.0 }
 0x335   : > { %v2640_v52 = vpop.f32.mrf.mxu0 }
 0x336   : > { %v1163_v60 = vpack.c.bf16 %v1140_v44, %v1139_v49 }
 0x338   : > { %1903 = vmatmul.msk.bf16.gmra.mxu0 %vm755_vm2, %v1163_v60  ;;  %v980_v60 = vpop.f32.mrf.mxu2 }
 0x339   : > { %v1081_v57 = vpop.f32.mrf.mxu3 }
 0x33a   : > { %v1082_v8 = vadd.f32 %v1081_v57, %v969_v63 }
 0x33c   : > { %v1141_v47 = vmax.f32 %v1082_v8, 0.0 }
 0x33d   : > { %v2644_v5 = vpop.f32.mrf.mxu0 }
 0x341   : > { %v1084_v55 = vpop.f32.mrf.mxu3 }
 0x342   : > { %v1085_v62 = vadd.f32 %v1084_v55, %v972_v53 }
 0x344   : > { %v1142_v3 = vmax.f32 %v1085_v62, 0.0 }
 0x345   : > { %v2647_v4 = vpop.f32.mrf.mxu0 }
 0x346   : > { %v1164_v9 = vpack.c.bf16 %v1142_v3, %v1141_v47  ;;  %v983_v47 = vpop.f32.mrf.mxu2  ;;  %v981_v3 = vadd.f32 %v2536_v7, %v980_v60  ;;  %v990_v60 = vadd.f32 %v2536_v7, %v2450_v36 }
 0x348   : > { %1904 = vmatmul.msk.bf16.gmra.mxu0 %vm755_vm2, %v1164_v9  ;;  %v984_v9 = vadd.f32 %v2536_v7, %v983_v47 }
 0x349   : > { %v1087_v44 = vpop.f32.mrf.mxu3 }
 0x34a   : > { %v1088_v49 = vadd.f32 %v1087_v44, %v975_v33 }
 0x34c   : > { %v1143_v63 = vmax.f32 %v1088_v49, 0.0 }
 0x34d   : > { %v2651_v56 = vpop.f32.mrf.mxu0 }
 0x351   : > { %v1090_v48 = vpop.f32.mrf.mxu3 }
 0x352   : > { %v1091_v57 = vadd.f32 %v1090_v48, %v978_v61 }
 0x354   : > { %v1144_v53 = vmax.f32 %v1091_v57, 0.0  ;;  %v986_v57 = vpop.f32.mrf.mxu2 }
 0x355   : > { %v2654_v8 = vpop.f32.mrf.mxu0 }
 0x356   : > { %v1165_v55 = vpack.c.bf16 %v1144_v53, %v1143_v63  ;;  %v987_v53 = vadd.f32 %v2536_v7, %v986_v57 }
 0x358   : > { %1905 = vmatmul.msk.bf16.gmra.mxu0 %vm755_vm2, %v1165_v55 }
 0x359   : > { %v1093_v62 = vpop.f32.mrf.mxu3 }
 0x35a   : > { %v1094_v13 = vadd.f32 %v1093_v62, %v981_v3 }
 0x35c   : > { %v1145_v41 = vmax.f32 %v1094_v13, 0.0 }
 0x35d   : > { %v2658_v0 = vpop.f32.mrf.mxu0 }
 0x361   : > { %v1096_v44 = vpop.f32.mrf.mxu3 }
 0x362   : > { %v1097_v33 = vadd.f32 %v1096_v44, %v984_v9 }
 0x364   : > { %v1146_v61 = vmax.f32 %v1097_v33, 0.0 }
 0x365   : > { %v2661_v49 = vpop.f32.mrf.mxu0 }
 0x366   : > { %v1166_v48 = vpack.c.bf16 %v1146_v61, %v1145_v41  ;;  %v993_v61 = vadd.f32 %v2536_v7, %v2461_v39  ;;  %v1002_v39 = vadd.f32 %v2536_v7, %v2495_v50 }
 0x368   : > { %1906 = vmatmul.msk.bf16.gmra.mxu0 %vm755_vm2, %v1166_v48  ;;  %v996_v48 = vadd.f32 %v2536_v7, %v2472_v42 }
 0x369   : > { %v1099_v63 = vpop.f32.mrf.mxu3 }
 0x36a   : > { %v1100_v38 = vadd.f32 %v1099_v63, %v987_v53 }
 0x36c   : > { %v1147_v3 = vmax.f32 %v1100_v38, 0.0 }
 0x36d   : > { %v1262_v55 = vpop.f32.mrf.mxu0 }
 0x371   : > { %v1102_v47 = vpop.f32.mrf.mxu3 }
 0x372   : > { %v1103_v62 = vadd.f32 %v1102_v47, %v990_v60 }
 0x374   : > { %v1148_v9 = vmax.f32 %v1103_v62, 0.0 }
 0x375   : > { %v1265_v13 = vpop.f32.mrf.mxu0 }
 0x376   : > { %v1167_v44 = vpack.c.bf16 %v1148_v9, %v1147_v3  ;;  %v999_v3 = vadd.f32 %v2536_v7, %v2482_v45  ;;  %v1008_v45 = vadd.f32 %v2536_v7, %v2523_v59 }
 0x378   : > { %1907 = vmatmul.msk.bf16.gmra.mxu0 %vm755_vm2, %v1167_v44 }
 0x379   : > { %v1105_v41 = vpop.f32.mrf.mxu3 }
 0x37a   : > { %v1106_v57 = vadd.f32 %v1105_v41, %v993_v61 }
 0x37c   : > { %v1149_v63 = vmax.f32 %v1106_v57, 0.0 }
 0x37d   : > { %v1267_v33 = vpop.f32.mrf.mxu0 }
 0x381   : > { %v1108_v35 = vpop.f32.mrf.mxu3 }
 0x382   : > { %v1109_v36 = vadd.f32 %v1108_v35, %v996_v48 }
 0x384   : > { %v1150_v53 = vmax.f32 %v1109_v36, 0.0 }
 0x385   : > { %v1270_v60 = vpop.f32.mrf.mxu0 }
 0x386   : > { %v1168_v38 = vpack.c.bf16 %v1150_v53, %v1149_v63  ;;  %v1005_v63 = vadd.f32 %v2536_v7, %v2512_v16 }
 0x388   : > { %1908 = vmatmul.msk.bf16.gmra.mxu0 %vm755_vm2, %v1168_v38 }
 0x389   : > { %v1111_v47 = vpop.f32.mrf.mxu3 }
 0x38a   : > { %v1112_v9 = vadd.f32 %v1111_v47, %v999_v3 }
 0x38c   : > { %v1151_v41 = vmax.f32 %v1112_v9, 0.0 }
 0x38d   : > { %v1272_v62 = vpop.f32.mrf.mxu0 }
 0x391   : > { %v1114_v44 = vpop.f32.mrf.mxu3 }
 0x392   : > { %v1115_v42 = vadd.f32 %v1114_v44, %v1002_v39 }
 0x394   : > { %v1152_v61 = vmax.f32 %v1115_v42, 0.0 }
 0x395   : > { %v1275_v35 = vpop.f32.mrf.mxu0 }
 0x396   : > { %v1169_v48 = vpack.c.bf16 %v1152_v61, %v1151_v41  ;;  %v2964_v41 = vld [vmem:[#allocation22_spill] sm:$0xff] }
 0x398   : > { %1909 = vmatmul.msk.bf16.gmra.mxu0 %vm755_vm2, %v1169_v48 }
 0x399   : > { %v1117_v57 = vpop.f32.mrf.mxu3 }
 0x39a   : > { %v1118_v53 = vadd.f32 %v1117_v57, %v1005_v63  ;;  %v2965_v57 = vld [vmem:[#allocation11_spill] sm:$0xff] }
 0x39b   : > { %v2966_v63 = vld [vmem:[#allocation23_spill] sm:$0xff] }
 0x39c   : > { %v1153_v47 = vmax.f32 %v1118_v53, 0.0 }
 0x39d   : > { %v1277_v36 = vpop.f32.mrf.mxu0 }
 0x3a1   : > { %v1120_v38 = vpop.f32.mrf.mxu3 }
 0x3a2   : > { %v1121_v50 = vadd.f32 %v1120_v38, %v1008_v45 }
 0x3a4   : > { %v1154_v3 = vmax.f32 %v1121_v50, 0.0 }
 0x3a5   : > { %v1280_v39 = vpop.f32.mrf.mxu0 }
 0x3a6   : > { %v1170_v9 = vpack.c.bf16 %v1154_v3, %v1153_v47  ;;  %v2967_v47 = vld [vmem:[#allocation24_spill] sm:$0xff] }
 0x3a8   : > { %1910 = vmatmul.msk.bf16.gmra.mxu0 %vm755_vm2, %v1170_v9 }
 0x3ad   : > { %v1282_v44 = vpop.f32.mrf.mxu0 }
 0x3ae   : > { %1330 = vmatpush.msrb.mxu1 %v1282_v44 }
 0x3b0   : > { %1331 = vmatpush.msrb.mxu1 %v1280_v39 }
 0x3b2   : > { %1332 = vmatpush.msrb.mxu1 %v1277_v36 }
 0x3b4   : > { %1333 = vmatpush.msrb.mxu1 %v1275_v35 }
 0x3b5   : > { %v1285_v42 = vpop.f32.mrf.mxu0 }
 0x3b6   : > { %1334 = vmatpush.msrb.mxu1 %v1272_v62 }
 0x3b8   : > { %1335 = vmatpush.msrb.mxu1 %v1270_v60  ;;  %v2963_v60 = vld [vmem:[#allocation10_spill] sm:$0xff] }
 0x3ba   : > { %1336 = vmatpush.msrb.mxu1 %v1267_v33 }
 0x3bc   : > { %1337 = vmatpush.msrb.mxu1 %v1265_v13 }
 0x3bd   : > { %v1287_v16 = vpop.f32.mrf.mxu0 }
 0x3be   : > { %1338 = vmatpush.msrb.mxu1 %v1262_v55 }
 0x3c0   : > { %1339 = vmatpush.msrb.mxu1 %v2661_v49 }
 0x3c2   : > { %1340 = vmatpush.msrb.mxu1 %v2658_v0 }
 0x3c4   : > { %1341 = vmatpush.msrb.mxu1 %v2654_v8 }
 0x3c5   : > { %v1290_v59 = vpop.f32.mrf.mxu0 }
 0x3c6   : > { %1342 = vmatpush.msrb.mxu1 %v2651_v56 }
 0x3c8   : > { %1343 = vmatpush.msrb.mxu1 %v2647_v4 }
 0x3ca   : > { %1344 = vmatpush.msrb.mxu1 %v2644_v5 }
 0x3cc   : > { %1345 = vmatpush.msrb.mxu1 %v2640_v52 }
 0x3cd   : > { %v1292_v7 = vpop.f32.mrf.mxu0  ;;  %1346 = vmatmul.f32.vlgmr.msrb.gmra.mxu1 %v2360_v10 }
 0x3d5   : > { %v1295_v13 = vpop.f32.mrf.mxu0  ;;  %1349 = vmatmul.f32.gmra.mxu1 %v2364_v12 }
 0x3dd   : > { %v1297_v49 = vpop.f32.mrf.mxu0  ;;  %1352 = vmatmul.f32.gmra.mxu1 %v2368_v14 }
 0x3e5   : > { %v1300_v0 = vpop.f32.mrf.mxu0  ;;  %1355 = vmatmul.f32.gmra.mxu1 %v2372_v15 }
 0x3ed   : > { %v1302_v8 = vpop.f32.mrf.mxu0  ;;  %1358 = vmatmul.f32.gmra.mxu1 %v2376_v17 }
 0x3f5   : > { %v1305_v4 = vpop.f32.mrf.mxu0  ;;  %1361 = vmatmul.f32.gmra.mxu1 %v2386_v19  ;;  %v2948_v19 = vld [vmem:[#allocation13_spill] sm:$0xff] }
 0x3fd   : > { %v1307_v5 = vpop.f32.mrf.mxu0  ;;  %1364 = vmatmul.f32.gmra.mxu1 %v2394_v21  ;;  %v2950_v21 = vld [vmem:[#allocation15_spill] sm:$0xff] }
 0x405   : > { %v1310_v52 = vpop.f32.mrf.mxu0  ;;  %1367 = vmatmul.f32.gmra.mxu1 %v2402_v23  ;;  %v2951_v23 = vld [vmem:[#allocation25_spill] sm:$0xff] }
 0x40d   : > { %v1312_v10 = vpop.f32.mrf.mxu0  ;;  %1370 = vmatmul.f32.gmra.mxu1 %v2410_v25 }
 0x415   : > { %v1315_v12 = vpop.f32.mrf.mxu0  ;;  %1373 = vmatmul.f32.gmra.mxu1 %v2418_v27 }
 0x41d   : > { %v1317_v14 = vpop.f32.mrf.mxu0  ;;  %1376 = vmatmul.f32.gmra.mxu1 %v2426_v29  ;;  %v2956_v29 = vld [vmem:[#allocation18_spill] sm:$0xff] }
 0x425   : > { %v1320_v15 = vpop.f32.mrf.mxu0  ;;  %1379 = vmatmul.f32.gmra.mxu1 %v2434_v31  ;;  %v2957_v31 = vld [vmem:[#allocation7_spill] sm:$0xff] }
 0x42d   : > { %v1322_v17 = vpop.f32.mrf.mxu0  ;;  %1382 = vmatmul.f32.gmra.mxu1 %v2445_v34  ;;  %v2737_v34 = vld [vmem:[%s2876_s6 + $0x1] ss:$0 sm:$0xff] }
 0x42e   : > { %1443 = vmatpush.msrb.mxu2 %v1322_v17  ;;  %v2971_v17 = vld [vmem:[#allocation29_spill] sm:$0xff] }
 0x430   : > { %1444 = vmatpush.msrb.mxu2 %v1320_v15 }
 0x432   : > { %1445 = vmatpush.msrb.mxu2 %v1317_v14 }
 0x434   : > { %1446 = vmatpush.msrb.mxu2 %v1315_v12 }
 0x435   : > { %1385 = vmatmul.f32.gmra.mxu1 %v2455_v37 }
 0x436   : > { %1447 = vmatpush.msrb.mxu2 %v1312_v10 }
 0x438   : > { %1448 = vmatpush.msrb.mxu2 %v1310_v52  ;;  %v2970_v52 = vld [vmem:[#allocation28_spill] sm:$0xff] }
 0x43a   : > { %1449 = vmatpush.msrb.mxu2 %v1307_v5 }
 0x43c   : > { %1450 = vmatpush.msrb.mxu2 %v1305_v4 }
 0x43d   : > { %1388 = vmatmul.f32.gmra.mxu1 %v2465_v40  ;;  %v2959_v40 = vld [vmem:[#allocation8_spill] sm:$0xff] }
 0x43e   : > { %1451 = vmatpush.msrb.mxu2 %v1302_v8 }
 0x440   : > { %1452 = vmatpush.msrb.mxu2 %v1300_v0 }
 0x442   : > { %1453 = vmatpush.msrb.mxu2 %v1297_v49  ;;  %v2969_v49 = vld [vmem:[#allocation27_spill] sm:$0xff] }
 0x444   : > { %1454 = vmatpush.msrb.mxu2 %v1295_v13 }
 0x445   : > { %1391 = vmatmul.f32.gmra.mxu1 %v2475_v43 }
 0x446   : > { %1455 = vmatpush.msrb.mxu2 %v1292_v7 }
 0x448   : > { %1456 = vmatpush.msrb.mxu2 %v1290_v59 }
 0x44a   : > { %1457 = vmatpush.msrb.mxu2 %v1287_v16 }
 0x44c   : > { %1458 = vmatpush.msrb.mxu2 %v1285_v42  ;;  %v2968_v42 = vld [vmem:[#allocation26_spill] sm:$0xff] }
 0x44d   : > { %1459 = vmatmul.f32.vlgmr.msrb.gmra.mxu2 %v2380_v18  ;;  %1394 = vmatmul.f32.gmra.mxu1 %v2485_v46  ;;  %v2947_v18 = vld [vmem:[#allocation12_spill] sm:$0xff] }
 0x44e   : > { %v2960_v46 = vld [vmem:[#allocation20_spill] sm:$0xff] }
 0x455   : > { %1462 = vmatmul.f32.gmra.mxu2 %v2389_v20  ;;  %1397 = vmatmul.f32.gmra.mxu1 %v2498_v51  ;;  %v2949_v20 = vld [vmem:[#allocation14_spill] sm:$0xff] }
 0x45d   : > { %1465 = vmatmul.f32.gmra.mxu2 %v2397_v22  ;;  %1400 = vmatmul.f32.gmra.mxu1 %v2506_v54  ;;  %v1347_v22 = vpop.f32.mrf.mxu1 }
 0x45e   : > { %v1348_v43 = vadd.f32 %v2737_v34, %v1347_v22 }
 0x465   : > { %1468 = vmatmul.f32.gmra.mxu2 %v2405_v24  ;;  %1403 = vmatmul.f32.gmra.mxu1 %v2519_v58  ;;  %v2952_v24 = vld [vmem:[#allocation16_spill] sm:$0xff]  ;;  %v1350_v25 = vpop.f32.mrf.mxu1 }
 0x46d   : > { %1471 = vmatmul.f32.gmra.mxu2 %v2413_v26  ;;  %1406 = vmatmul.f32.gmra.mxu1 %v2529_v1  ;;  %v2953_v26 = vld [vmem:[#allocation5_spill] sm:$0xff]  ;;  %v1353_v27 = vpop.f32.mrf.mxu1 }
 0x46e   : > { %v2961_v1 = vld [vmem:[#allocation9_spill] sm:$0xff]  ;;  %v1354_v62 = vadd.f32 %v2737_v34, %v1353_v27 }
 0x475   : > { %1474 = vmatmul.f32.gmra.mxu2 %v2421_v28  ;;  %1409 = vmatmul.f32.gmra.mxu1 %v2542_v11  ;;  %v2955_v28 = vld [vmem:[#allocation6_spill] sm:$0xff]  ;;  %v1351_v11 = vadd.f32 %v2737_v34, %v1350_v25 }
 0x47d   : > { %1477 = vmatmul.f32.gmra.mxu2 %v2429_v30  ;;  %1412 = vmatmul.f32.gmra.mxu1 %v2552_v2  ;;  %v2954_v2 = vld [vmem:[#allocation17_spill] sm:$0xff]  ;;  %v1356_v30 = vpop.f32.mrf.mxu1 }
 0x47e   : > { %v1357_v36 = vadd.f32 %v2737_v34, %v1356_v30 }
 0x485   : > { %1480 = vmatmul.f32.gmra.mxu2 %v2437_v32  ;;  %1415 = vmatmul.f32.gmra.mxu1 %v2561_v6  ;;  %v2958_v32 = vld [vmem:[#allocation19_spill] sm:$0xff]  ;;  %v1359_v37 = vpop.f32.mrf.mxu1  ;;  %v2962_v6 = vld [vmem:[#allocation21_spill] sm:$0xff] }
 0x486   : > { %v1360_v50 = vadd.f32 %v2737_v34, %v1359_v37 }
 0x48d   : > { %1483 = vmatmul.f32.gmra.mxu2 %v2947_v18  ;;  %1418 = vmatmul.f32.gmra.mxu1 %v2951_v23  ;;  %v1362_v58 = vpop.f32.mrf.mxu1 }
 0x48e   : > { %v1363_v44 = vadd.f32 %v2737_v34, %v1362_v58 }
 0x495   : > { %1486 = vmatmul.f32.gmra.mxu2 %v2948_v19  ;;  %1421 = vmatmul.f32.gmra.mxu1 %v2953_v26  ;;  %v1365_v33 = vpop.f32.mrf.mxu1 }
 0x496   : > { %v1366_v13 = vadd.f32 %v2737_v34, %v1365_v33 }
 0x49d   : > { %1489 = vmatmul.f32.gmra.mxu2 %v2949_v20  ;;  %1424 = vmatmul.f32.gmra.mxu1 %v2955_v28  ;;  %v1368_v48 = vpop.f32.mrf.mxu1  ;;  %v2975_v28 = vld [vmem:[#allocation33_spill] sm:$0xff] }
 0x49e   : > { %v1369_v5 = vadd.f32 %v2737_v34, %v1368_v48 }
 0x4a5   : > { %1492 = vmatmul.f32.gmra.mxu2 %v2950_v21  ;;  %1427 = vmatmul.f32.gmra.mxu1 %v2957_v31  ;;  %v1371_v38 = vpop.f32.mrf.mxu1  ;;  %v2972_v21 = vld [vmem:[#allocation30_spill] sm:$0xff] }
 0x4a6   : > { %v1372_v15 = vadd.f32 %v2737_v34, %v1371_v38  ;;  %v2976_v31 = vld [vmem:[#allocation34_spill] sm:$0xff] }
 0x4ad   : > { %1495 = vmatmul.f32.gmra.mxu2 %v2952_v24  ;;  %1430 = vmatmul.f32.gmra.mxu1 %v2959_v40  ;;  %v1374_v9 = vpop.f32.mrf.mxu1  ;;  %v2973_v24 = vld [vmem:[#allocation31_spill] sm:$0xff] }
 0x4ae   : > { %v2977_v40 = vld [vmem:[#allocation35_spill] sm:$0xff]  ;;  %v1375_v38 = vadd.f32 %v2737_v34, %v1374_v9 }
 0x4b5   : > { %1498 = vmatmul.f32.gmra.mxu2 %v2954_v2  ;;  %1433 = vmatmul.f32.gmra.mxu1 %v2961_v1  ;;  %v1377_v7 = vpop.f32.mrf.mxu1  ;;  %v2974_v2 = vld [vmem:[#allocation32_spill] sm:$0xff] }
 0x4b6   : > { %v2978_v1 = vld [vmem:[#allocation36_spill] sm:$0xff] }
 0x4bd   : > { %1501 = vmatmul.f32.gmra.mxu2 %v2956_v29  ;;  %1436 = vmatmul.f32.gmra.mxu1 %v2963_v60  ;;  %v1380_v4 = vpop.f32.mrf.mxu1 }
 0x4c5   : > { %1504 = vmatmul.f32.gmra.mxu2 %v2958_v32  ;;  %1439 = vmatmul.f32.gmra.mxu1 %v2965_v57  ;;  %v1383_v14 = vpop.f32.mrf.mxu1  ;;  %v1378_v57 = vadd.f32 %v2737_v34, %v1377_v7 }
 0x4cd   : > { %1507 = vmatmul.f32.gmra.mxu2 %v2960_v46  ;;  %v1386_v20 = vpop.f32.mrf.mxu1 }
 0x4d0   : > { %v1460_v51 = vpop.f32.mrf.mxu2 }
 0x4d1   : > { %v2742_v54 = vadd.f32 %v1460_v51, %v1348_v43 }
 0x4d5   : > { %1510 = vmatmul.f32.gmra.mxu2 %v2962_v6  ;;  %v1389_v23 = vpop.f32.mrf.mxu1 }
 0x4d6   : > { %v1390_v51 = vadd.f32 %v2737_v34, %v1389_v23 }
 0x4d8   : > { %v1463_v56 = vpop.f32.mrf.mxu2 }
 0x4d9   : > { %v2747_v55 = vadd.f32 %v1463_v56, %v1351_v11  ;;  %v1387_v11 = vadd.f32 %v2737_v34, %v1386_v20  ;;  %v1384_v56 = vadd.f32 %v2737_v34, %v1383_v14 }
 0x4dd   : > { %1513 = vmatmul.f32.gmra.mxu2 %v2964_v41  ;;  %v1392_v26 = vpop.f32.mrf.mxu1  ;;  %v1381_v41 = vadd.f32 %v2737_v34, %v1380_v4 }
 0x4de   : > { %v1393_v58 = vadd.f32 %v2737_v34, %v1392_v26  ;;  %v1556_v26 = vmax.f32 %v2742_v54, 0.0 }
 0x4e0   : > { %v1466_v61 = vpop.f32.mrf.mxu2 }
 0x4e1   : > { %v2752_v35 = vadd.f32 %v1466_v61, %v1354_v62 }
 0x4e5   : > { %1516 = vmatmul.f32.gmra.mxu2 %v2966_v63  ;;  %v1395_v29 = vpop.f32.mrf.mxu1 }
 0x4e8   : > { %v1469_v45 = vpop.f32.mrf.mxu2 }
 0x4e9   : > { %v2757_v53 = vadd.f32 %v1469_v45, %v1357_v36  ;;  %v1396_v45 = vadd.f32 %v2737_v34, %v1395_v29 }
 0x4eb   : > { %v1559_v23 = vmax.f32 %v2757_v53, 0.0 }
 0x4ed   : > { %1519 = vmatmul.f32.gmra.mxu2 %v2967_v47  ;;  %v1398_v32 = vpop.f32.mrf.mxu1 }
 0x4ee   : > { %v1399_v4 = vadd.f32 %v2737_v34, %v1398_v32 }
 0x4f0   : > { %v1472_v3 = vpop.f32.mrf.mxu2 }
 0x4f1   : > { %v2761_v39 = vadd.f32 %v1472_v3, %v1360_v50 }
 0x4f5   : > { %1522 = vmatmul.f32.gmra.mxu2 %v2968_v42  ;;  %v1401_v46 = vpop.f32.mrf.mxu1 }
 0x4f8   : > { %v1475_v16 = vpop.f32.mrf.mxu2 }
 0x4f9   : > { %v2765_v59 = vadd.f32 %v1475_v16, %v1363_v44 }
 0x4fb   : > { %v1561_v20 = vmax.f32 %v2765_v59, 0.0 }
 0x4fd   : > { %1525 = vmatmul.f32.gmra.mxu2 %v2969_v49  ;;  %v1404_v62 = vpop.f32.mrf.mxu1 }
 0x500   : > { %v1478_v0 = vpop.f32.mrf.mxu2 }
 0x501   : > { %v2769_v8 = vadd.f32 %v1478_v0, %v1366_v13 }
 0x505   : > { %1528 = vmatmul.f32.gmra.mxu2 %v2970_v52  ;;  %v1407_v7 = vpop.f32.mrf.mxu1 }
 0x508   : > { %v1481_v10 = vpop.f32.mrf.mxu2 }
 0x509   : > { %v2773_v12 = vadd.f32 %v1481_v10, %v1369_v5 }
 0x50b   : > { %v1563_v14 = vmax.f32 %v2773_v12, 0.0  ;;  %v1558_v12 = vmax.f32 %v2752_v35, 0.0 }
 0x50d   : > { %1531 = vmatmul.f32.gmra.mxu2 %v2971_v17  ;;  %v1402_v17 = vadd.f32 %v2737_v34, %v1401_v46 }
 0x510   : > { %v1484_v18 = vpop.f32.mrf.mxu2 }
 0x511   : > { %v1485_v19 = vadd.f32 %v1484_v18, %v1372_v15  ;;  %v1562_v15 = vmax.f32 %v2769_v8, 0.0  ;;  %v1410_v18 = vpop.f32.mrf.mxu1  ;;  %v1405_v8 = vadd.f32 %v2737_v34, %v1404_v62 }
 0x513   : > { %v1564_v52 = vmax.f32 %v1485_v19, 0.0 }
 0x515   : > { %1534 = vmatmul.f32.gmra.mxu2 %v2972_v21 }
 0x518   : > { %v1487_v22 = vpop.f32.mrf.mxu2 }
 0x519   : > { %v1488_v13 = vadd.f32 %v1487_v22, %v1375_v38  ;;  %v1560_v22 = vmax.f32 %v2761_v39, 0.0  ;;  %v1413_v59 = vpop.f32.mrf.mxu1  ;;  %v494_v38 = vld [vmem:[%s2824_s23 + $0x10] sm:$0xff] }
 0x51b   : > { %v1565_v5 = vmax.f32 %v1488_v13, 0.0 }
 0x51d   : > { %1537 = vmatmul.f32.gmra.mxu2 %v2973_v24  ;;  %v1557_v24 = vmax.f32 %v2747_v55, 0.0 }
 0x520   : > { %v1490_v25 = vpop.f32.mrf.mxu2 }
 0x521   : > { %v1491_v44 = vadd.f32 %v1490_v25, %v1378_v57  ;;  %v1416_v35 = vpop.f32.mrf.mxu1 }
 0x523   : > { %v1566_v0 = vmax.f32 %v1491_v44, 0.0 }
 0x525   : > { %1540 = vmatmul.f32.gmra.mxu2 %v2974_v2  ;;  %v1408_v2 = vadd.f32 %v2737_v34, %v1407_v7 }
 0x528   : > { %v1493_v27 = vpop.f32.mrf.mxu2 }
 0x529   : > { %v1494_v50 = vadd.f32 %v1493_v27, %v1381_v41  ;;  %v1419_v55 = vpop.f32.mrf.mxu1 }
 0x52b   : > { %v1567_v49 = vmax.f32 %v1494_v50, 0.0 }
 0x52d   : > { %1543 = vmatmul.f32.gmra.mxu2 %v2975_v28  ;;  %v1411_v28 = vadd.f32 %v2737_v34, %v1410_v18 }
 0x530   : > { %v1496_v30 = vpop.f32.mrf.mxu2 }
 0x531   : > { %v1497_v36 = vadd.f32 %v1496_v30, %v1384_v56 }
 0x533   : > { %v1568_v42 = vmax.f32 %v1497_v36, 0.0  ;;  %v492_v36 = vld [vmem:[%s2824_s23] sm:$0xff] }
 0x535   : > { %1546 = vmatmul.f32.gmra.mxu2 %v2976_v31  ;;  %v1414_v31 = vadd.f32 %v2737_v34, %v1413_v59 }
 0x538   : > { %v1499_v37 = vpop.f32.mrf.mxu2 }
 0x539   : > { %v1500_v61 = vadd.f32 %v1499_v37, %v1387_v11  ;;  %v1417_v37 = vadd.f32 %v2737_v34, %v1416_v35 }
 0x53b   : > { %v1569_v47 = vmax.f32 %v1500_v61, 0.0 }
 0x53d   : > { %1549 = vmatmul.f32.gmra.mxu2 %v2977_v40  ;;  %v1422_v40 = vpop.f32.mrf.mxu1 }
 0x540   : > { %v1502_v43 = vpop.f32.mrf.mxu2 }
 0x541   : > { %v1503_v33 = vadd.f32 %v1502_v43, %v1390_v51  ;;  %v1420_v51 = vadd.f32 %v2737_v34, %v1419_v55 }
 0x543   : > { %v1570_v63 = vmax.f32 %v1503_v33, 0.0 }
 0x545   : > { %1552 = vmatmul.f32.gmra.mxu2 %v2978_v1  ;;  %v1425_v1 = vpop.f32.mrf.mxu1 }
 0x548   : > { %v1505_v6 = vpop.f32.mrf.mxu2 }
 0x549   : > { %v1506_v60 = vadd.f32 %v1505_v6, %v1393_v58 }
 0x54b   : > { %v1571_v48 = vmax.f32 %v1506_v60, 0.0 }
 0x54d   : > { %1588 = vmatpush.msra.mxu3 %v1571_v48  ;;  %v1428_v56 = vpop.f32.mrf.mxu1 }
 0x54e   : > { %v1429_v7 = vadd.f32 %v2737_v34, %v1428_v56 }
 0x54f   : > { %1589 = vmatpush.msra.mxu3 %v1570_v63 }
 0x550   : > { %v1508_v3 = vpop.f32.mrf.mxu2 }
 0x551   : > { %1590 = vmatpush.msra.mxu3 %v1569_v47  ;;  %v2792_v16 = vadd.f32 %v1508_v3, %v1396_v45 }
 0x553   : > { %1591 = vmatpush.msra.mxu3 %v1568_v42  ;;  %v1572_v35 = vmax.f32 %v2792_v16, 0.0 }
 0x555   : > { %1592 = vmatpush.msra.mxu3 %v1567_v49  ;;  %v1431_v60 = vpop.f32.mrf.mxu1 }
 0x556   : > { %v1432_v42 = vadd.f32 %v2737_v34, %v1431_v60 }
 0x557   : > { %1593 = vmatpush.msra.mxu3 %v1566_v0 }
 0x558   : > { %v1511_v9 = vpop.f32.mrf.mxu2 }
 0x559   : > { %1594 = vmatpush.msra.mxu3 %v1565_v5  ;;  %v2795_v10 = vadd.f32 %v1511_v9, %v1399_v4  ;;  %v1426_v5 = vadd.f32 %v2737_v34, %v1425_v1 }
 0x55b   : > { %1595 = vmatpush.msra.mxu3 %v1564_v52 }
 0x55d   : > { %1596 = vmatpush.msra.mxu3 %v1563_v14  ;;  %v1434_v41 = vpop.f32.mrf.mxu1  ;;  %v1423_v14 = vadd.f32 %v2737_v34, %v1422_v40 }
 0x55e   : > { %v1435_v3 = vadd.f32 %v2737_v34, %v1434_v41 }
 0x55f   : > { %1597 = vmatpush.msra.mxu3 %v1562_v15 }
 0x560   : > { %v1514_v21 = vpop.f32.mrf.mxu2 }
 0x561   : > { %1598 = vmatpush.msra.mxu3 %v1561_v20  ;;  %v2802_v19 = vadd.f32 %v1514_v21, %v1402_v17 }
 0x563   : > { %1599 = vmatpush.msra.mxu3 %v1560_v22 }
 0x565   : > { %1600 = vmatpush.msra.mxu3 %v1559_v23  ;;  %v1437_v57 = vpop.f32.mrf.mxu1 }
 0x566   : > { %v1438_v50 = vadd.f32 %v2737_v34, %v1437_v57 }
 0x567   : > { %1601 = vmatpush.msra.mxu3 %v1558_v12 }
 0x568   : > { %v1517_v25 = vpop.f32.mrf.mxu2 }
 0x569   : > { %1602 = vmatpush.msra.mxu3 %v1557_v24  ;;  %v2809_v39 = vadd.f32 %v1517_v25, %v1405_v8 }
 0x56b   : > { %1603 = vmatpush.msra.mxu3 %v1556_v26  ;;  %v1575_v26 = vmax.f32 %v2809_v39, 0.0  ;;  %v1948_v39 = vld [vmem:[%s2877_s7 + $0x8] sm:$0xff] }
 0x56c   : > { %1604 = vmatmul.f32.vlgmr.msra.gmra.mxu3 %v492_v36 }
 0x56d   : > { %v1440_v45 = vpop.f32.mrf.mxu1 }
 0x56e   : > { %v1441_v47 = vadd.f32 %v2737_v34, %v1440_v45 }
 0x570   : > { %v1520_v53 = vpop.f32.mrf.mxu2 }
 0x571   : > { %v2812_v27 = vadd.f32 %v1520_v53, %v1408_v2  ;;  %v1574_v2 = vmax.f32 %v2802_v19, 0.0  ;;  %v1573_v53 = vmax.f32 %v2795_v10, 0.0  ;;  %v1947_v19 = vld [vmem:[%s2877_s7] sm:$0xff] }
 0x573   : > { %v1576_v59 = vmax.f32 %v2812_v27, 0.0 }
 0x574   : > { %1607 = vmatmul.f32.gmra.mxu3 %v494_v38 }
 0x578   : > { %v1523_v29 = vpop.f32.mrf.mxu2 }
 0x579   : > { %v2815_v30 = vadd.f32 %v1523_v29, %v1411_v28  ;;  %v493_v28 = vld [vmem:[%s2824_s23 + $0x8] sm:$0xff]  ;;  %v495_v29 = vld [vmem:[%s2824_s23 + $0x18] sm:$0xff] }
 0x57b   : > { %v1577_v34 = vmax.f32 %v2815_v30, 0.0 }
 0x580   : > { %v1526_v32 = vpop.f32.mrf.mxu2 }
 0x581   : > { %v1527_v54 = vadd.f32 %v1526_v32, %v1414_v31 }
 0x583   : > { %v1578_v25 = vmax.f32 %v1527_v54, 0.0  ;;  %v2012_v54 = vld [vmem:[%s2878_s8] ss:$0 sm:$0xff] }
 0x588   : > { %v1529_v43 = vpop.f32.mrf.mxu2 }
 0x589   : > { %v1530_v46 = vadd.f32 %v1529_v43, %v1417_v37 }
 0x58b   : > { %v1579_v24 = vmax.f32 %v1530_v46, 0.0 }
 0x590   : > { %v1532_v58 = vpop.f32.mrf.mxu2 }
 0x591   : > { %v1533_v11 = vadd.f32 %v1532_v58, %v1420_v51 }
 0x593   : > { %v1580_v8 = vmax.f32 %v1533_v11, 0.0 }
 0x598   : > { %v1535_v6 = vpop.f32.mrf.mxu2 }
 0x599   : > { %v1536_v21 = vadd.f32 %v1535_v6, %v1423_v14 }
 0x59b   : > { %v1581_v12 = vmax.f32 %v1536_v21, 0.0 }
 0x5a0   : > { %v1538_v33 = vpop.f32.mrf.mxu2 }
 0x5a1   : > { %v1539_v18 = vadd.f32 %v1538_v33, %v1426_v5 }
 0x5a3   : > { %v1582_v23 = vmax.f32 %v1539_v18, 0.0 }
 0x5a8   : > { %v1541_v62 = vpop.f32.mrf.mxu2 }
 0x5a9   : > { %v1542_v15 = vadd.f32 %v1541_v62, %v1429_v7 }
 0x5ab   : > { %v1583_v22 = vmax.f32 %v1542_v15, 0.0 }
 0x5b0   : > { %v1544_v61 = vpop.f32.mrf.mxu2 }
 0x5b1   : > { %v1545_v9 = vadd.f32 %v1544_v61, %v1432_v42 }
 0x5b3   : > { %v1584_v20 = vmax.f32 %v1545_v9, 0.0 }
 0x5b8   : > { %v1547_v48 = vpop.f32.mrf.mxu2 }
 0x5b9   : > { %v1548_v0 = vadd.f32 %v1547_v48, %v1435_v3 }
 0x5bb   : > { %v1585_v17 = vmax.f32 %v1548_v0, 0.0 }
 0x5c0   : > { %v1550_v63 = vpop.f32.mrf.mxu2 }
 0x5c1   : > { %v1551_v13 = vadd.f32 %v1550_v63, %v1438_v50 }
 0x5c3   : > { %v1586_v52 = vmax.f32 %v1551_v13, 0.0 }
 0x5c8   : > { %v1553_v44 = vpop.f32.mrf.mxu2 }
 0x5c9   : > { %v1554_v49 = vadd.f32 %v1553_v44, %v1441_v47 }
 0x5cb   : > { %v1587_v4 = vmax.f32 %v1554_v49, 0.0 }
 0x5cd   : > { %1611 = vmatpush.msrb.mxu3 %v1587_v4 }
 0x5cf   : > { %1612 = vmatpush.msrb.mxu3 %v1586_v52 }
 0x5d1   : > { %1613 = vmatpush.msrb.mxu3 %v1585_v17 }
 0x5d3   : > { %1614 = vmatpush.msrb.mxu3 %v1584_v20 }
 0x5d5   : > { %1615 = vmatpush.msrb.mxu3 %v1583_v22 }
 0x5d7   : > { %1616 = vmatpush.msrb.mxu3 %v1582_v23 }
 0x5d9   : > { %1617 = vmatpush.msrb.mxu3 %v1581_v12 }
 0x5db   : > { %1618 = vmatpush.msrb.mxu3 %v1580_v8 }
 0x5dd   : > { %1619 = vmatpush.msrb.mxu3 %v1579_v24 }
 0x5df   : > { %1620 = vmatpush.msrb.mxu3 %v1578_v25 }
 0x5e1   : > { %1621 = vmatpush.msrb.mxu3 %v1577_v34 }
 0x5e3   : > { %1622 = vmatpush.msrb.mxu3 %v1576_v59 }
 0x5e5   : > { %1623 = vmatpush.msrb.mxu3 %v1575_v26 }
 0x5e7   : > { %1624 = vmatpush.msrb.mxu3 %v1574_v2 }
 0x5e9   : > { %1625 = vmatpush.msrb.mxu3 %v1573_v53 }
 0x5eb   : > { %1626 = vmatpush.msrb.mxu3 %v1572_v35 }
 0x5ec   : > { %1627 = vmatmul.f32.vlgmr.msrb.gmra.mxu3 %v493_v28 }
 0x5ed   : > { %1664 = vmatpush.bf16.msra.mxu3 %v1948_v39 }
 0x5ef   : > { %v1605_v10 = vpop.f32.mrf.mxu3 }
 0x5f1   : > { %1665 = vmatpush.bf16.msra.mxu3 %v1947_v19 }
 0x5f4   : > { %1630 = vmatmul.f32.gmra.mxu3 %v495_v29 }
 0x5f7   : > { %v1608_v27 = vpop.f32.mrf.mxu3 }
 0x66f   : > { %v1628_v16 = vpop.f32.mrf.mxu3 }
 0x670   : > { %v1629_v55 = vadd.f32 %v1628_v16, %v1605_v10 }
 0x677   : > { %v1631_v30 = vpop.f32.mrf.mxu3 }
 0x678   : > { %v1632_v31 = vadd.f32 %v1631_v30, %v1608_v27 }
 0x67a   : > { %v1634_v32 = vpack.c.bf16 %v1632_v31, %v1629_v55 }
 0x67c   : > { %1920 = vmatmul.msk.bf16.vlgmr.msra.gmra.mxu3 %vm755_vm2, %v1634_v32 }
 0x6ff   : > { %v1667_v37 = vpop.f32.mrf.mxu3 }
 0x700   : > { %v1668_v40 = vadd.f32 %v2012_v54, %v1667_v37 }
 0x702   : > { %1672 = vst [vmem:[%s394_s28] sm:$0xff] %v1668_v40 }
 0x707   : > { %v1669_v43 = vpop.f32.mrf.mxu3 }
 0x708   : > { %v1670_v46 = vadd.f32 %v2012_v54, %v1669_v43 }
 0x70a   : > { %1673 = vst [vmem:[%s394_s28 + $0x8] sm:$0xff] %v1670_v46 }
 0x70b PF: > { %p19_p7 = scmp.ge.s32.totalorder %s2153_s14, 4   ;;  %s2979_s30 = smov %s2069_s10 }
 0x70c   : > { %s2980_s10 = smov %s2073_s11  ;;  %s2981_s11 = smov %s2163_s17 }
 0x70d   : > { %s2982_s12 = smov %s2153_s14  ;;  %21 = sbr.rel (!%p19_p7) target bundleno = 3 (0x3), region = 104 }
 0x712   :  { %1695 = vsyncpa [#allocation3], 1 }
 0x713   :  { %1697 = vsyncpa [#allocation3 + $0x1], 1 }

</bundles_post_ra>
